<compile_context>
chip_gen: v6e
topology: v6e:2x2x1
jax: 0.10.0
libtpu: 0.0.40
codegen_flags: <defaults>
</compile_context>

<pallas_src>
import functools
import math

import jax
import jax.numpy as jnp
from jax.experimental import pallas as pl
from jax.experimental.pallas import tpu as pltpu

EPS = 10 * -6  # literal value from the source module (== -60; typo for 1e-6)


def _round_up(x, m):
    return (x + m - 1) // m * m


# ----------------------------------------------------------------------------
# Fused kernel: [residual tanh-linear layer]*L  +  LayerNormalization epilogue
# ----------------------------------------------------------------------------
def _fused_encoder_kernel(x_ref, w_ref, b_ref, alpha_ref, beta_ref, o_ref,
                          *, n_layers, features, f_pad, eps):
    # (block_rows, f_pad); padded feature lanes are exactly zero and stay zero
    # through the layer chain (zero-padded W columns/rows and biases).
    h = x_ref[...].astype(jnp.float32)

    # ---- layer chain (stand-in for the injected nn.ModuleList) -------------
    for l in range(n_layers):  # static unroll, L is small
        # bf16 MXU operands, f32 accumulation.
        y = jnp.dot(h.astype(jnp.bfloat16), w_ref[l],
                    preferred_element_type=jnp.float32)
        y = y + b_ref[l]                      # (1, f_pad) broadcast
        h = h + jnp.tanh(y)

    # ---- LayerNormalization (two-pass reduction, EUP reciprocal) -----------
    inv_f = 1.0 / features
    mean = jnp.sum(h, axis=-1, keepdims=True) * inv_f    # padded lanes are 0
    c = h - mean
    if f_pad != features:
        # Padded lanes would otherwise contribute (-mean)^2 to the variance.
        lane = jax.lax.broadcasted_iota(jnp.int32, (1, f_pad), 1)
        c = jnp.where(lane < features, c, 0.0)
    # torch .std() uses Bessel's correction (ddof = 1).
    var = jnp.sum(c * c, axis=-1, keepdims=True) * (1.0 / (features - 1))
    std = jnp.sqrt(var)
    rinv = pl.reciprocal(std + eps, approx=True)          # EUP slot, not VALU divide
    y = alpha_ref[...] * c * rinv + beta_ref[...]
    o_ref[...] = y.astype(o_ref.dtype)


def pallas_encoder_forward(x, w_p, b_p, alpha_p, beta_p, *, features,
                           eps=EPS, out_dtype=jnp.float32, row_tile_cap=2048):
    """x: (B, S, F).  w_p: (L, f_pad, f_pad) bf16.  b_p: (L, 1, f_pad) f32."""
    B, S, F = x.shape
    assert F == features
    L, f_pad, _ = w_p.shape
    rows = B * S

    # Row tile: as large as the cap allows, but keep the grid length >= 2 so
    # dimension_semantics=("parallel",) can split work across v7x's two TCs.
    block_rows = max(8, min(row_tile_cap, _round_up(pl.cdiv(rows, 2), 8)))
    num_row_blocks = pl.cdiv(rows, block_rows)   # ragged last tile is masked

    x2d = x.reshape(rows, F).astype(jnp.float32)
    if f_pad != F:
        # Lane pad only (needed so padded lanes are exactly zero for the LN
        # reduction).  Row padding is NOT needed: Pallas masks ragged tiles.
        x2d = jnp.pad(x2d, ((0, 0), (0, f_pad - F)))

    kernel = functools.partial(_fused_encoder_kernel,
                               n_layers=L, features=F, f_pad=f_pad, eps=eps)

    # ---- VMEM budget --------------------------------------------------------
    out_itemsize = jnp.dtype(out_dtype).itemsize
    pipeline_bytes = (2 * block_rows * f_pad * 4              # x tiles (2-buf)
                      + 2 * block_rows * f_pad * out_itemsize)  # out tiles (2-buf)
    resident_bytes = 2 * (L * f_pad * f_pad * 2               # bf16 weights
                          + L * f_pad * 4                      # biases
                          + 2 * f_pad * 4)                     # alpha / beta
    temp_bytes = 4 * block_rows * f_pad * 4   # h f32, bf16 h, matmul out, LN temps
    vmem_bytes = pipeline_bytes + resident_bytes + temp_bytes

    try:  # generation-aware ceiling (64 MiB on v7x, 128 MiB on v5e/v6e)
        vmem_cap = int(pltpu.get_tpu_info().vmem_capacity_bytes)
    except Exception:
        vmem_cap = 64 << 20  # conservative (v7x-sized) fallback
    vmem_limit = int(min(max(2 * vmem_bytes, 32 << 20), (vmem_cap * 3) // 4))

    out = pl.pallas_call(
        kernel,
        out_shape=jax.ShapeDtypeStruct((rows, f_pad), out_dtype),
        grid_spec=pltpu.PrefetchScalarGridSpec(
            num_scalar_prefetch=0,
            grid=(num_row_blocks,),
            in_specs=[
                pl.BlockSpec((block_rows, f_pad), lambda i: (i, 0)),   # x rows
                pl.BlockSpec((L, f_pad, f_pad), lambda i: (0, 0, 0)),  # W (resident)
                pl.BlockSpec((L, 1, f_pad), lambda i: (0, 0, 0)),      # b (resident)
                pl.BlockSpec((1, f_pad), lambda i: (0, 0)),            # alpha
                pl.BlockSpec((1, f_pad), lambda i: (0, 0)),            # beta
            ],
            out_specs=pl.BlockSpec((block_rows, f_pad), lambda i: (i, 0)),
        ),
        compiler_params=pltpu.CompilerParams(
            dimension_semantics=("parallel",),      # both TCs on v7x
            vmem_limit_bytes=vmem_limit,
        ),
    )(x2d, w_p, b_p, alpha_p, beta_p)

    if f_pad != F:
        out = out[:, :F]
    return out.reshape(B, S, F)


# ----------------------------------------------------------------------------
# Encoder wrapper (same structure as the PyTorch module)
# ----------------------------------------------------------------------------
class PallasEncoder:
    def __init__(self, features, w_stack, b_stack, *,
                 out_dtype=jnp.float32, row_tile_cap=2048):
        L, F, _ = w_stack.shape
        assert F == features
        self.features = F
        self.f_pad = _round_up(F, 128)
        pad_f = self.f_pad - F
        # One-time padding + bf16 cast of resident operands (hoisted out of
        # the per-call path so no padded/cast copies are re-materialized in
        # HBM on every forward).
        self.w_p = jnp.pad(
            w_stack, ((0, 0), (0, pad_f), (0, pad_f))).astype(jnp.bfloat16)
        self.b_p = jnp.pad(
            b_stack, ((0, 0), (0, pad_f))).reshape(L, 1, self.f_pad).astype(jnp.float32)
        # LayerNormalization params: alpha = ones, beta = ones (per __init__)
        self.alpha = jnp.ones((F,), jnp.float32)
        self.beta = jnp.ones((F,), jnp.float32)
        self.alpha_p = jnp.pad(self.alpha, (0, pad_f)).reshape(1, self.f_pad)
        self.beta_p = jnp.pad(self.beta, (0, pad_f)).reshape(1, self.f_pad)
        self.out_dtype = out_dtype
        self.row_tile_cap = row_tile_cap

    def __call__(self, x, mask):
        del mask  # consumed by the real injected layers (attention); unused here
        return pallas_encoder_forward(
            x, self.w_p, self.b_p, self.alpha_p, self.beta_p,
            features=self.features, out_dtype=self.out_dtype,
            row_tile_cap=self.row_tile_cap)


# ----------------------------------------------------------------------------
# Pure-JAX reference (same math) for a sanity check
# ----------------------------------------------------------------------------
def reference_forward(x, w_stack, b_stack, alpha, beta, eps=EPS):
    B, S, F = x.shape
    h = x.reshape(B * S, F).astype(jnp.float32)
    for l in range(w_stack.shape[0]):
        y = jnp.dot(h.astype(jnp.bfloat16), w_stack[l].astype(jnp.bfloat16),
                    preferred_element_type=jnp.float32) + b_stack[l]
        h = h + jnp.tanh(y)
    mean = jnp.mean(h, axis=-1, keepdims=True)
    var = jnp.sum((h - mean) ** 2, axis=-1, keepdims=True) / (F - 1)
    std = jnp.sqrt(var)
    y = alpha * (h - mean) / (std + eps) + beta
    return y.reshape(B, S, F)


if __name__ == "__main__":
    # Small transformer-encoder-ish shapes; F = d_model = 128 keeps the lane
    # dimension dense.  S=300 gives rows=600, which does NOT divide the row
    # tile -> exercises the ragged (un-padded) last tile path.
    B, S, F, L = 2, 300, 128, 2

    key = jax.random.PRNGKey(0)
    kx, kw, kb = jax.random.split(key, 3)
    x = jax.random.normal(kx, (B, S, F), dtype=jnp.float32)
    # attention-style mask shape (batch, 1, 1, seq), as used by the real model
    mask = jnp.ones((B, 1, 1, S), dtype=jnp.float32)

    w_stack = (jax.random.normal(kw, (L, F, F), dtype=jnp.float32)
               * (1.0 / math.sqrt(F)))
    b_stack = jax.random.normal(kb, (L, F), dtype=jnp.float32) * 0.1

    encoder = PallasEncoder(F, w_stack, b_stack)
    fwd = jax.jit(lambda xx, mm: encoder(xx, mm))

    out = fwd(x, mask)
    jax.block_until_ready(out)

    assert out.shape == (B, S, F), out.shape
    assert out.dtype == jnp.float32
    assert bool(jnp.all(jnp.isfinite(out)))

    ref = reference_forward(x, w_stack, b_stack, encoder.alpha, encoder.beta)
    max_err = float(jnp.max(jnp.abs(out - ref)))
    assert max_err < 5e-2, f"max abs error vs reference: {max_err}"

    print("KERNEL_OK")
</pallas_src>

<mosaic_0001>
module attributes {stable_mosaic.version = 11 : i64} {
  func.func @_fused_encoder_kernel(%arg0: i32, %arg1: memref<304x128xf32, #tpu.memory_space<vmem>>, %arg2: memref<2x128x128xbf16, #tpu.memory_space<vmem>>, %arg3: memref<2x1x128xf32, #tpu.memory_space<vmem>>, %arg4: memref<1x128xf32, #tpu.memory_space<vmem>>, %arg5: memref<1x128xf32, #tpu.memory_space<vmem>>, %arg6: memref<304x128xf32, #tpu.memory_space<vmem>>) attributes {dimension_semantics = [#tpu.dimension_semantics<parallel>], iteration_bounds = array<i64: 2>, scalar_prefetch = 0 : i64, scratch_operands = 0 : i64, tpu.core_type = #tpu.core_type<tc>, window_params = [{transform_indices = @transform_0, window_bounds = array<i64: 304, 128>}, {pipeline_mode = #tpu.pipeline_mode<synchronous>, transform_indices = @transform_1, window_bounds = array<i64: 2, 128, 128>}, {pipeline_mode = #tpu.pipeline_mode<synchronous>, transform_indices = @transform_2, window_bounds = array<i64: 2, 1, 128>}, {pipeline_mode = #tpu.pipeline_mode<synchronous>, transform_indices = @transform_3, window_bounds = array<i64: 1, 128>}, {pipeline_mode = #tpu.pipeline_mode<synchronous>, transform_indices = @transform_4, window_bounds = array<i64: 1, 128>}, {transform_indices = @transform_5, window_bounds = array<i64: 304, 128>}]} {
    %c0 = arith.constant 0 : index
    %c0_0 = arith.constant 0 : index
    %0 = vector.load %arg1[%c0, %c0_0] : memref<304x128xf32, #tpu.memory_space<vmem>>, vector<304x128xf32>
    %1 = arith.truncf %0 : vector<304x128xf32> to vector<304x128xbf16>
    %c0_1 = arith.constant 0 : index
    %c0_2 = arith.constant 0 : index
    %c0_3 = arith.constant 0 : index
    %2 = vector.load %arg2[%c0_1, %c0_2, %c0_3] : memref<2x128x128xbf16, #tpu.memory_space<vmem>>, vector<1x128x128xbf16>
    %3 = vector.shape_cast %2 : vector<1x128x128xbf16> to vector<128x128xbf16>
    %cst = arith.constant dense<0.000000e+00> : vector<304x128xf32>
    %4 = tpu.matmul %1, %3, %cst {dimension_numbers = #tpu.dot_dimension_numbers<[1], [0], [0], [1], [0, 0, 1, 1], [], []>} : vector<304x128xbf16>, vector<128x128xbf16>, vector<304x128xf32> -> vector<304x128xf32>
    %c0_4 = arith.constant 0 : index
    %c0_5 = arith.constant 0 : index
    %c0_6 = arith.constant 0 : index
    %5 = vector.load %arg3[%c0_4, %c0_5, %c0_6] : memref<2x1x128xf32, #tpu.memory_space<vmem>>, vector<1x1x128xf32>
    %6 = vector.shape_cast %5 : vector<1x1x128xf32> to vector<1x128xf32>
    %7 = vector.broadcast %6 : vector<1x128xf32> to vector<304x128xf32>
    %8 = arith.addf %4, %7 : vector<304x128xf32>
    %9 = math.tanh %8 : vector<304x128xf32>
    %10 = arith.addf %0, %9 : vector<304x128xf32>
    %11 = arith.truncf %10 : vector<304x128xf32> to vector<304x128xbf16>
    %c1 = arith.constant 1 : index
    %c0_7 = arith.constant 0 : index
    %c0_8 = arith.constant 0 : index
    %12 = vector.load %arg2[%c1, %c0_7, %c0_8] : memref<2x128x128xbf16, #tpu.memory_space<vmem>>, vector<1x128x128xbf16>
    %13 = vector.shape_cast %12 : vector<1x128x128xbf16> to vector<128x128xbf16>
    %cst_9 = arith.constant dense<0.000000e+00> : vector<304x128xf32>
    %14 = tpu.matmul %11, %13, %cst_9 {dimension_numbers = #tpu.dot_dimension_numbers<[1], [0], [0], [1], [0, 0, 1, 1], [], []>} : vector<304x128xbf16>, vector<128x128xbf16>, vector<304x128xf32> -> vector<304x128xf32>
    %c1_10 = arith.constant 1 : index
    %c0_11 = arith.constant 0 : index
    %c0_12 = arith.constant 0 : index
    %15 = vector.load %arg3[%c1_10, %c0_11, %c0_12] : memref<2x1x128xf32, #tpu.memory_space<vmem>>, vector<1x1x128xf32>
    %16 = vector.shape_cast %15 : vector<1x1x128xf32> to vector<1x128xf32>
    %17 = vector.broadcast %16 : vector<1x128xf32> to vector<304x128xf32>
    %18 = arith.addf %14, %17 : vector<304x128xf32>
    %19 = math.tanh %18 : vector<304x128xf32>
    %20 = arith.addf %10, %19 : vector<304x128xf32>
    %cst_13 = arith.constant dense<0.000000e+00> : vector<304xf32>
    %21 = vector.multi_reduction <add>, %20, %cst_13 [1] : vector<304x128xf32> to vector<304xf32>
    %22 = vector.shape_cast %21 : vector<304xf32> to vector<304x1xf32>
    %cst_14 = arith.constant 7.812500e-03 : f32
    %23 = vector.broadcast %cst_14 : f32 to vector<304x1xf32>
    %24 = arith.mulf %22, %23 : vector<304x1xf32>
    %25 = vector.broadcast %24 : vector<304x1xf32> to vector<304x128xf32>
    %26 = arith.subf %20, %25 : vector<304x128xf32>
    %27 = arith.mulf %26, %26 : vector<304x128xf32>
    %cst_15 = arith.constant dense<0.000000e+00> : vector<304xf32>
    %28 = vector.multi_reduction <add>, %27, %cst_15 [1] : vector<304x128xf32> to vector<304xf32>
    %29 = vector.shape_cast %28 : vector<304xf32> to vector<304x1xf32>
    %cst_16 = arith.constant 0.00787401571 : f32
    %30 = vector.broadcast %cst_16 : f32 to vector<304x1xf32>
    %31 = arith.mulf %29, %30 : vector<304x1xf32>
    %32 = math.sqrt %31 : vector<304x1xf32>
    %cst_17 = arith.constant -6.000000e+01 : f32
    %33 = vector.broadcast %cst_17 : f32 to vector<304x1xf32>
    %34 = arith.addf %32, %33 : vector<304x1xf32>
    %35 = tpu.reciprocal %34 {approx = true} : vector<304x1xf32> -> vector<304x1xf32>
    %c0_18 = arith.constant 0 : index
    %c0_19 = arith.constant 0 : index
    %36 = vector.load %arg4[%c0_18, %c0_19] : memref<1x128xf32, #tpu.memory_space<vmem>>, vector<1x128xf32>
    %37 = vector.broadcast %36 : vector<1x128xf32> to vector<304x128xf32>
    %38 = arith.mulf %37, %26 : vector<304x128xf32>
    %39 = vector.broadcast %35 : vector<304x1xf32> to vector<304x128xf32>
    %40 = arith.mulf %38, %39 : vector<304x128xf32>
    %c0_20 = arith.constant 0 : index
    %c0_21 = arith.constant 0 : index
    %41 = vector.load %arg5[%c0_20, %c0_21] : memref<1x128xf32, #tpu.memory_space<vmem>>, vector<1x128xf32>
    %42 = vector.broadcast %41 : vector<1x128xf32> to vector<304x128xf32>
    %43 = arith.addf %40, %42 : vector<304x128xf32>
    %c0_22 = arith.constant 0 : index
    %c0_23 = arith.constant 0 : index
    %44 = vector.load %arg6[%c0_22, %c0_23] : memref<304x128xf32, #tpu.memory_space<vmem>>, vector<304x128xf32>
    tpu.vector_store %arg6[%c0_22, %c0_23], %43 {strides = array<i32>} : memref<304x128xf32, #tpu.memory_space<vmem>>, vector<304x128xf32>,
    return
  }
  func.func @transform_0(%arg0: i32) -> (i32, i32) {
    %c0_i32 = arith.constant 0 : i32
    %c0_i32_0 = arith.constant 0 : i32
    return %arg0, %c0_i32 : i32, i32
  }
  func.func @transform_1(%arg0: i32) -> (i32, i32, i32) {
    %c0_i32 = arith.constant 0 : i32
    %c0_i32_0 = arith.constant 0 : i32
    %c0_i32_1 = arith.constant 0 : i32
    %c0_i32_2 = arith.constant 0 : i32
    return %c0_i32, %c0_i32_0, %c0_i32_1 : i32, i32, i32
  }
  func.func @transform_2(%arg0: i32) -> (i32, i32, i32) {
    %c0_i32 = arith.constant 0 : i32
    %c0_i32_0 = arith.constant 0 : i32
    %c0_i32_1 = arith.constant 0 : i32
    %c0_i32_2 = arith.constant 0 : i32
    return %c0_i32, %c0_i32_0, %c0_i32_1 : i32, i32, i32
  }
  func.func @transform_3(%arg0: i32) -> (i32, i32) {
    %c0_i32 = arith.constant 0 : i32
    %c0_i32_0 = arith.constant 0 : i32
    %c0_i32_1 = arith.constant 0 : i32
    return %c0_i32, %c0_i32_0 : i32, i32
  }
  func.func @transform_4(%arg0: i32) -> (i32, i32) {
    %c0_i32 = arith.constant 0 : i32
    %c0_i32_0 = arith.constant 0 : i32
    %c0_i32_1 = arith.constant 0 : i32
    return %c0_i32, %c0_i32_0 : i32, i32
  }
  func.func @transform_5(%arg0: i32) -> (i32, i32) {
    %c0_i32 = arith.constant 0 : i32
    %c0_i32_0 = arith.constant 0 : i32
    return %arg0, %c0_i32 : i32, i32
  }
}

</mosaic_0001>

<bundles_post_ra>
// kernel: _lambda_.1
= control target key start
LH: loop header
LB: loop body
LE: loop exit
PB: predicated region body
PF: predicated region fallthrough
CT: control target
= control target key end

     0   :  { %s2998_s18 = smov 0   ;;  %s3000_s19 = smov 0   ;;  %s4479_s0 = inlined_call_operand.vmem [shape: f32[600,128], index: 0, kind: input, shape index: {}]   ;;  %s4480_s1 = inlined_call_operand.vmem [shape: bf16[2,128,128], index: 1, kind: input, shape index: {}]   ;;  %s4481_s2 = inlined_call_operand.vmem [shape: f32[2,1,128], index: 2, kind: input, shape index: {}]   ;;  %s4482_s3 = inlined_call_operand.vmem [shape: f32[1,128], index: 3, kind: input, shape index: {}, may-alias: {3,4}]   ;;  %s4483_s4 = inlined_call_operand.vmem [shape: f32[1,128], index: 4, kind: input, shape index: {}, may-alias: {3,4}]   ;;  %s4484_s5 = inlined_call_operand.vmem [shape: f32[600,128], index: 5, kind: output, shape index: {}]  }
   0x1   :  { %s3002_s20 = smov 0  }
   0x2 LB: > { %s3011_s21 = sadd.s32 4294967295, %s2932_s20   ;;  %s3013_s22 = sadd.s32 1, %s2932_s20   ;;  %s2932_s20 = sphi %s3002_s20, %s4493_s20   ;;  %s2928_s19 = sphi %s3000_s19, %s4492_s19   ;;  %s2924_s18 = sphi %s2998_s18, %s4491_s18  }
   0x3   : > { %s129_s23 = ssub.s32 %s2932_s20, %s3013_s22  ;;  %s132_s24 = sadd.s32 1, %s2928_s19 }
   0x4   : > { %p130_p0 = scmp.eq.s32.totalorder %s129_s23, 0  ;;  %p142_p1 = scmp.ne.s32.totalorder %s2928_s19, %s2924_s18 }
   0x5   : > { %p143_p2 = scmp.eq.s32.totalorder %s3011_s21, 1  ;;  %p2170_p3 = scmp.ge.s32.totalorder %s2932_s20, 1 }
   0x6   : > { %s3021_s25 = scalar_select %p130_p0, %s2928_s19, %s132_s24  }
   0x7   : > { %p3023_p4 = por %p143_p2, %p142_p1  ;;  %p196_p5 = scmp.lt.s32.totalorder %s2932_s20, 3 }
   0x9   : > { %p197_p6 = pnand %p2170_p3, %p196_p5 }
   0xa   : > { %s3045_s8 = smul.u32 (!%p197_p6), 38, %s3011_s21  ;;  %s224_s7 = sand.u32 (!%p197_p6), 1, %s2924_s18  }
   0xb   : > { %200 = sbr.rel (%p197_p6) target bundleno = 1014 (0x3f6), region = 40 }
   0xc   : > { %p232_p7 = scmp.lt.s32.totalorder (!%p197_p6), %s3045_s8, 74  ;;  %s2460_s11 = smul.u32 (!%p197_p6), 304, %s224_s7 }
  0x10   : > { %v2552_v0 = vld [vmem:[%s4480_s1 + $0x38] sm:$0xff]   ;;  %v2966_v1 = vmov 0.0   ;;  %v2553_v2 = vld [vmem:[%s4480_s1 + $0x30] sm:$0xff]   ;;  %vm2967_vm0 = vmmov 0   ;;  %v2554_v3 = vld [vmem:[%s4480_s1 + $0x28] sm:$0xff]   ;;  %s233_s13 = scalar_select %p232_p7, %s3045_s8, 74 }
  0x11   : > { %2276 = vmatprep.subr.bf16.mxu0 %v2966_v1  ;;  %2368 = vmatprep.subr.bf16.mxu1 %v2966_v1  ;;  %v2555_v4 = vld [vmem:[%s4480_s1 + $0x20] sm:$0xff]   ;;  %v2556_v5 = vld [vmem:[%s4480_s1 + $0x18] sm:$0xff]   ;;  %v2557_v6 = vld [vmem:[%s4480_s1 + $0x10] sm:$0xff]   ;;  %s2221_s23 = smul.u32 (%p3023_p4), 304, %s3011_s21 }
  0x12   : > { %2277 = vmatpush3.bf16.msra.mxu0 %v2552_v0  ;;  %2292 = vmatprep.mubr.msk.bf16.mxu0 %vm2967_vm0, %v2966_v1  ;;  %v2558_v7 = vld [vmem:[%s4480_s1 + $0x8] sm:$0xff]   ;;  %s2171_s20 = sshll.u32 %s233_s13, 3  ;;  %v2559_v8 = vld [vmem:[%s4480_s1] sm:$0xff]   ;;  %v2560_v18 = vld [vmem:[%s4480_s1 + $0x78] sm:$0xff]   ;;  %s3955_s13 = scalar_lea.vmem [#allocation2], %s2460_s11  }
  0x13   : > { %2278 = vmatprep.subr.bf16.mxu0 %v2966_v1  ;;  %2384 = vmatprep.mubr.msk.bf16.mxu1 %vm2967_vm0, %v2966_v1  ;;  %s3068_s27 = scalar_lea.vmem %s4479_s0, %s2171_s20  ;;  %v2561_v21 = vld [vmem:[%s4480_s1 + $0x70] sm:$0xff]   ;;  %v2562_v38 = vld [vmem:[%s4480_s1 + $0x68] sm:$0xff]   ;;  %v2563_v42 = vld [vmem:[%s4480_s1 + $0x60] sm:$0xff]   ;;  %s1809_s20 = ssub.s32 (%p3023_p4), 75, %s3045_s8 }
  0x14   : > { %v3074_v9 = vld [vmem:[%s3068_s27] sm:$0xff]  ;;  %v3077_v10 = vld [vmem:[%s3068_s27 + $0x8] sm:$0xff]  ;;  %v3085_v12 = vld [vmem:[%s3068_s27 + $0x10] sm:$0xff]  ;;  %2369 = vmatpush3.bf16.msra.mxu1 %v2560_v18  ;;  %p1810_p8 = scmp.lt.s32.totalorder (%p3023_p4), %s1809_s20, 38  ;;  %s4337_s29 = scalar_lea.vmem (%p3023_p4), %s4484_s5, %s2221_s23  }
  0x15   : > { %v285_v11 = vpack.c.bf16 %v3077_v10, %v3074_v9  ;;  %v3088_v13 = vld [vmem:[%s3068_s27 + $0x18] sm:$0xff]  ;;  %v3095_v15 = vld [vmem:[%s3068_s27 + $0x20] sm:$0xff]  ;;  %v3098_v16 = vld [vmem:[%s3068_s27 + $0x28] sm:$0xff]  ;;  %2370 = vmatprep.subr.bf16.mxu1 %v2966_v1 }
  0x16   : > { %2279 = vmatpush3.bf16.msra.mxu0 %v2553_v2  ;;  %v286_v14 = vpack.c.bf16 %v3088_v13, %v3085_v12  ;;  %v287_v17 = vpack.c.bf16 %v3098_v16, %v3095_v15  ;;  %v3108_v19 = vld [vmem:[%s3068_s27 + $0x30] sm:$0xff]  ;;  %v3111_v20 = vld [vmem:[%s3068_s27 + $0x38] sm:$0xff]  ;;  %v3123_v23 = vld [vmem:[%s3068_s27 + $0x40] sm:$0xff] }
  0x17   : > { %2280 = vmatprep.subr.bf16.mxu0 %v2966_v1  ;;  %v288_v22 = vpack.c.bf16 %v3111_v20, %v3108_v19  ;;  %v3126_v24 = vld [vmem:[%s3068_s27 + $0x48] sm:$0xff]  ;;  %v3133_v26 = vld [vmem:[%s3068_s27 + $0x50] sm:$0xff]  ;;  %v3136_v27 = vld [vmem:[%s3068_s27 + $0x58] sm:$0xff] }
  0x18   : > { %2371 = vmatpush3.bf16.msra.mxu1 %v2561_v21  ;;  %v289_v25 = vpack.c.bf16 %v3126_v24, %v3123_v23  ;;  %v290_v28 = vpack.c.bf16 %v3136_v27, %v3133_v26  ;;  %v3143_v29 = vld [vmem:[%s3068_s27 + $0x60] sm:$0xff]  ;;  %v3146_v30 = vld [vmem:[%s3068_s27 + $0x68] sm:$0xff]  ;;  %v3153_v32 = vld [vmem:[%s3068_s27 + $0x70] sm:$0xff] }
  0x19   : > { %2372 = vmatprep.subr.bf16.mxu1 %v2966_v1  ;;  %v291_v31 = vpack.c.bf16 %v3146_v30, %v3143_v29  ;;  %v3156_v33 = vld [vmem:[%s3068_s27 + $0x78] sm:$0xff]  ;;  %v3163_v35 = vld [vmem:[%s3068_s27 + $0x80] sm:$0xff]  ;;  %v3166_v36 = vld [vmem:[%s3068_s27 + $0x88] sm:$0xff] }
  0x1a   : > { %2281 = vmatpush3.bf16.msra.mxu0 %v2554_v3  ;;  %v292_v34 = vpack.c.bf16 %v3156_v33, %v3153_v32  ;;  %v293_v37 = vpack.c.bf16 %v3166_v36, %v3163_v35  ;;  %v3176_v39 = vld [vmem:[%s3068_s27 + $0x90] sm:$0xff]  ;;  %v3179_v40 = vld [vmem:[%s3068_s27 + $0x98] sm:$0xff]  ;;  %v3194_v44 = vld [vmem:[%s3068_s27 + $0xa0] sm:$0xff] }
  0x1b   : > { %2282 = vmatprep.subr.bf16.mxu0 %v2966_v1  ;;  %v294_v41 = vpack.c.bf16 %v3179_v40, %v3176_v39  ;;  %v2564_v43 = vld [vmem:[%s4480_s1 + $0x58] sm:$0xff]   ;;  %v3197_v45 = vld [vmem:[%s3068_s27 + $0xa8] sm:$0xff]  ;;  %v2565_v47 = vld [vmem:[%s4480_s1 + $0x50] sm:$0xff]  }
  0x1c   : > { %2373 = vmatpush3.bf16.msra.mxu1 %v2562_v38  ;;  %v295_v46 = vpack.c.bf16 %v3197_v45, %v3194_v44  ;;  %v2566_v48 = vld [vmem:[%s4480_s1 + $0x48] sm:$0xff]   ;;  %v3212_v49 = vld [vmem:[%s3068_s27 + $0xb0] sm:$0xff]  ;;  %v3215_v50 = vld [vmem:[%s3068_s27 + $0xb8] sm:$0xff] }
  0x1d   : > { %2374 = vmatprep.subr.bf16.mxu1 %v2966_v1  ;;  %v296_v51 = vpack.c.bf16 %v3215_v50, %v3212_v49  ;;  %v2567_v52 = vld [vmem:[%s4480_s1 + $0x40] sm:$0xff]   ;;  %v3229_v54 = vld [vmem:[%s3068_s27 + $0xc8] sm:$0xff]  ;;  %v3236_v56 = vld [vmem:[%s3068_s27 + $0xd0] sm:$0xff] }
  0x1e   : > { %2283 = vmatpush3.bf16.msra.mxu0 %v2555_v4  ;;  %v3226_v53 = vld [vmem:[%s3068_s27 + $0xc0] sm:$0xff]  ;;  %v3239_v57 = vld [vmem:[%s3068_s27 + $0xd8] sm:$0xff]  ;;  %v3249_v60 = vld [vmem:[%s3068_s27 + $0xe8] sm:$0xff] }
  0x1f   : > { %2284 = vmatprep.subr.bf16.mxu0 %v2966_v1  ;;  %v297_v55 = vpack.c.bf16 %v3229_v54, %v3226_v53  ;;  %v298_v58 = vpack.c.bf16 %v3239_v57, %v3236_v56  ;;  %v3246_v59 = vld [vmem:[%s3068_s27 + $0xe0] sm:$0xff]  ;;  %v3256_v62 = vld [vmem:[%s3068_s27 + $0xf0] sm:$0xff]  ;;  %v3259_v63 = vld [vmem:[%s3068_s27 + $0xf8] sm:$0xff] }
  0x20   : > { %2375 = vmatpush3.bf16.msra.mxu1 %v2563_v42  ;;  %v299_v61 = vpack.c.bf16 %v3249_v60, %v3246_v59  ;;  %v300_v0 = vpack.c.bf16 %v3259_v63, %v3256_v62  ;;  %v3266_v2 = vld [vmem:[%s3068_s27 + $0x100] sm:$0xff]  ;;  %v3269_v3 = vld [vmem:[%s3068_s27 + $0x108] sm:$0xff] }
  0x21   : > { %2376 = vmatprep.subr.bf16.mxu1 %v2966_v1  ;;  %v301_v4 = vpack.c.bf16 %v3269_v3, %v3266_v2 }
  0x22   : > { %2285 = vmatpush3.bf16.msra.mxu0 %v2556_v5  ;;  %v3276_v5 = vld [vmem:[%s3068_s27 + $0x110] sm:$0xff] }
  0x23   : > { %2286 = vmatprep.subr.bf16.mxu0 %v2966_v1 }
  0x24   : > { %2377 = vmatpush3.bf16.msra.mxu1 %v2564_v43 }
  0x25   : > { %2378 = vmatprep.subr.bf16.mxu1 %v2966_v1 }
  0x26   : > { %2287 = vmatpush3.bf16.msra.mxu0 %v2557_v6  ;;  %v3279_v6 = vld [vmem:[%s3068_s27 + $0x118] sm:$0xff] }
  0x27   : > { %2288 = vmatprep.subr.bf16.mxu0 %v2966_v1 }
  0x28   : > { %2379 = vmatpush3.bf16.msra.mxu1 %v2565_v47 }
  0x29   : > { %2380 = vmatprep.subr.bf16.mxu1 %v2966_v1 }
  0x2a   : > { %2289 = vmatpush3.bf16.msra.mxu0 %v2558_v7  ;;  %v302_v7 = vpack.c.bf16 %v3279_v6, %v3276_v5 }
  0x2b   : > { %2290 = vmatprep.subr.bf16.mxu0 %v2966_v1 }
  0x2c   : > { %2381 = vmatpush3.bf16.msra.mxu1 %v2566_v48 }
  0x2d   : > { %2382 = vmatprep.subr.bf16.mxu1 %v2966_v1 }
  0x2e   : > { %2291 = vmatpush3.bf16.msra.mxu0 %v2559_v8  ;;  %v3286_v8 = vld [vmem:[%s3068_s27 + $0x120] sm:$0xff] }
  0x30   : > { %2383 = vmatpush3.bf16.msra.mxu1 %v2567_v52 }
  0x31   : > { %2293 = vmatmul.mubr.bf16.vlgmr.msra.gmra.mxu0 %v285_v11  ;;  %v3289_v11 = vld [vmem:[%s3068_s27 + $0x128] sm:$0xff] }
  0x32   : > { %2296 = vmatprep.mubr.msk.bf16.mxu0 %vm2967_vm0, %v2966_v1 }
  0x39   : > { %2297 = vmatmul.mubr.bf16.gmra.mxu0 %v286_v14  ;;  %v303_v14 = vpack.c.bf16 %v3289_v11, %v3286_v8 }
  0x3a   : > { %2300 = vmatprep.mubr.msk.bf16.mxu0 %vm2967_vm0, %v2966_v1 }
  0x41   : > { %2301 = vmatmul.mubr.bf16.gmra.mxu0 %v287_v17  ;;  %v3296_v17 = vld [vmem:[%s4481_s2] ss:$0 sm:$0xff] }
  0x42   : > { %2304 = vmatprep.mubr.msk.bf16.mxu0 %vm2967_vm0, %v2966_v1 }
  0x49   : > { %2305 = vmatmul.mubr.bf16.gmra.mxu0 %v288_v22 }
  0x4a   : > { %2308 = vmatprep.mubr.msk.bf16.mxu0 %vm2967_vm0, %v2966_v1 }
  0x51   : > { %2309 = vmatmul.mubr.bf16.gmra.mxu0 %v289_v25 }
  0x52   : > { %2312 = vmatprep.mubr.msk.bf16.mxu0 %vm2967_vm0, %v2966_v1 }
  0x59   : > { %2313 = vmatmul.mubr.bf16.gmra.mxu0 %v290_v28 }
  0x5a   : > { %2316 = vmatprep.mubr.msk.bf16.mxu0 %vm2967_vm0, %v2966_v1 }
  0x61   : > { %2317 = vmatmul.mubr.bf16.gmra.mxu0 %v291_v31 }
  0x62   : > { %2320 = vmatprep.mubr.msk.bf16.mxu0 %vm2967_vm0, %v2966_v1 }
  0x69   : > { %2321 = vmatmul.mubr.bf16.gmra.mxu0 %v292_v34 }
  0x6a   : > { %2324 = vmatprep.mubr.msk.bf16.mxu0 %vm2967_vm0, %v2966_v1 }
  0x71   : > { %2325 = vmatmul.mubr.bf16.gmra.mxu0 %v293_v37 }
  0x72   : > { %2328 = vmatprep.mubr.msk.bf16.mxu0 %vm2967_vm0, %v2966_v1 }
  0x79   : > { %2329 = vmatmul.mubr.bf16.gmra.mxu0 %v294_v41 }
  0x7a   : > { %2332 = vmatprep.mubr.msk.bf16.mxu0 %vm2967_vm0, %v2966_v1 }
  0x81   : > { %2333 = vmatmul.mubr.bf16.gmra.mxu0 %v295_v46 }
  0x82   : > { %2336 = vmatprep.mubr.msk.bf16.mxu0 %vm2967_vm0, %v2966_v1 }
  0x89   : > { %2337 = vmatmul.mubr.bf16.gmra.mxu0 %v296_v51 }
  0x8a   : > { %2340 = vmatprep.mubr.msk.bf16.mxu0 %vm2967_vm0, %v2966_v1 }
  0x91   : > { %2341 = vmatmul.mubr.bf16.gmra.mxu0 %v297_v55 }
  0x92   : > { %2344 = vmatprep.mubr.msk.bf16.mxu0 %vm2967_vm0, %v2966_v1 }
  0x99   : > { %2345 = vmatmul.mubr.bf16.gmra.mxu0 %v298_v58 }
  0x9a   : > { %2348 = vmatprep.mubr.msk.bf16.mxu0 %vm2967_vm0, %v2966_v1 }
  0xa1   : > { %2349 = vmatmul.mubr.bf16.gmra.mxu0 %v299_v61 }
  0xa2   : > { %2352 = vmatprep.mubr.msk.bf16.mxu0 %vm2967_vm0, %v2966_v1 }
  0xa9   : > { %2353 = vmatmul.mubr.bf16.gmra.mxu0 %v300_v0 }
  0xaa   : > { %2356 = vmatprep.mubr.msk.bf16.mxu0 %vm2967_vm0, %v2966_v1 }
  0xb1   : > { %2357 = vmatmul.mubr.bf16.gmra.mxu0 %v301_v4 }
  0xb2   : > { %2360 = vmatprep.mubr.msk.bf16.mxu0 %vm2967_vm0, %v2966_v1 }
  0xb9   : > { %2361 = vmatmul.mubr.bf16.gmra.mxu0 %v302_v7 }
  0xba   : > { %2364 = vmatprep.mubr.msk.bf16.mxu0 %vm2967_vm0, %v2966_v1 }
  0xc1   : > { %2365 = vmatmul.mubr.bf16.gmra.mxu0 %v303_v14 }
  0xf1   : > { %v409_v18 = vpop.f32.mrf.mxu0 }
  0xf2   : > { %v410_v21 = vadd.f32 %v3296_v17, %v409_v18 }
  0xf3   : > { %v2294_v22 = vpop.f32.mrf.mxu0 }
  0xf4   : > { %2568 = vtanh.f32 %v410_v21 }
  0xf5   : > { %v412_v25 = vpop.f32.mrf.mxu0 }
  0xf6   : > { %v413_v28 = vadd.f32 %v3296_v17, %v412_v25 }
  0xf7   : > { %v2295_v31 = vpop.f32.mrf.mxu0 }
  0xf8   : > { %2570 = vtanh.f32 %v413_v28 }
  0xf9   : > { %v417_v34 = vpop.f32.mrf.mxu0 }
  0xfa   : > { %v418_v37 = vadd.f32 %v3296_v17, %v417_v34 }
  0xfb   : > { %v2298_v38 = vpop.f32.mrf.mxu0 }
  0xfc   : > { %2572 = vtanh.f32 %v418_v37 }
  0xfd   : > { %v420_v41 = vpop.f32.mrf.mxu0 }
  0xfe   : > { %v421_v42 = vadd.f32 %v3296_v17, %v420_v41 }
  0xff   : > { %v2299_v43 = vpop.f32.mrf.mxu0 }
 0x100   : > { %2574 = vtanh.f32 %v421_v42 }
 0x101   : > { %v425_v46 = vpop.f32.mrf.mxu0  ;;  %v2569_v48 = vpop.eup %2568 }
 0x102   : > { %v426_v47 = vadd.f32 %v3296_v17, %v425_v46  ;;  %v3305_v61 = vadd.f32 %v2569_v48, %v3074_v9 }
 0x103   : > { %v2302_v51 = vpop.f32.mrf.mxu0 }
 0x104   : > { %2576 = vtanh.f32 %v426_v47 }
 0x105   : > { %v2571_v52 = vpop.eup %2570  ;;  %v428_v55 = vpop.f32.mrf.mxu0 }
 0x106   : > { %v429_v58 = vadd.f32 %v3296_v17, %v428_v55  ;;  %v3308_v0 = vadd.f32 %v2571_v52, %v3077_v10 }
 0x107   : > { %v2303_v4 = vpop.f32.mrf.mxu0 }
 0x108   : > { %2578 = vtanh.f32 %v429_v58  ;;  %v636_v7 = vpack.c.bf16 %v3308_v0, %v3305_v61 }
 0x109   : > { %v433_v14 = vpop.f32.mrf.mxu0  ;;  %v2573_v21 = vpop.eup %2572 }
 0x10a   : > { %v434_v18 = vadd.f32 %v3296_v17, %v433_v14  ;;  %2385 = vmatmul.mubr.bf16.vlgmr.msra.gmra.mxu1 %v636_v7  ;;  %v3317_v28 = vadd.f32 %v2573_v21, %v3085_v12 }
 0x10b   : > { %v2306_v22 = vpop.f32.mrf.mxu0  ;;  %2388 = vmatprep.mubr.msk.bf16.mxu1 %vm2967_vm0, %v2966_v1 }
 0x10c   : > { %2580 = vtanh.f32 %v434_v18 }
 0x10d   : > { %v2575_v25 = vpop.eup %2574  ;;  %v436_v9 = vpop.f32.mrf.mxu0 }
 0x10e   : > { %v437_v10 = vadd.f32 %v3296_v17, %v436_v9  ;;  %v3320_v31 = vadd.f32 %v2575_v25, %v3088_v13 }
 0x10f   : > { %v2307_v34 = vpop.f32.mrf.mxu0 }
 0x110   : > { %2582 = vtanh.f32 %v437_v10  ;;  %v637_v37 = vpack.c.bf16 %v3320_v31, %v3317_v28 }
 0x111   : > { %v441_v38 = vpop.f32.mrf.mxu0  ;;  %v2577_v42 = vpop.eup %2576 }
 0x112   : > { %v442_v41 = vadd.f32 %v3296_v17, %v441_v38  ;;  %2389 = vmatmul.mubr.bf16.gmra.mxu1 %v637_v37  ;;  %v3329_v47 = vadd.f32 %v2577_v42, %v3095_v15 }
 0x113   : > { %v2310_v43 = vpop.f32.mrf.mxu0  ;;  %2392 = vmatprep.mubr.msk.bf16.mxu1 %vm2967_vm0, %v2966_v1 }
 0x114   : > { %2584 = vtanh.f32 %v442_v41 }
 0x115   : > { %v2579_v46 = vpop.eup %2578  ;;  %v444_v12 = vpop.f32.mrf.mxu0 }
 0x116   : > { %v445_v13 = vadd.f32 %v3296_v17, %v444_v12  ;;  %v3332_v48 = vadd.f32 %v2579_v46, %v3098_v16 }
 0x117   : > { %v2311_v51 = vpop.f32.mrf.mxu0 }
 0x118   : > { %2586 = vtanh.f32 %v445_v13  ;;  %v638_v52 = vpack.c.bf16 %v3332_v48, %v3329_v47 }
 0x119   : > { %v449_v55 = vpop.f32.mrf.mxu0  ;;  %v2581_v4 = vpop.eup %2580 }
 0x11a   : > { %v450_v58 = vadd.f32 %v3296_v17, %v449_v55  ;;  %2393 = vmatmul.mubr.bf16.gmra.mxu1 %v638_v52  ;;  %v3341_v18 = vadd.f32 %v2581_v4, %v3108_v19 }
 0x11b   : > { %v2314_v7 = vpop.f32.mrf.mxu0  ;;  %2396 = vmatprep.mubr.msk.bf16.mxu1 %vm2967_vm0, %v2966_v1 }
 0x11c   : > { %2588 = vtanh.f32 %v450_v58 }
 0x11d   : > { %v2583_v14 = vpop.eup %2582  ;;  %v452_v15 = vpop.f32.mrf.mxu0 }
 0x11e   : > { %v453_v16 = vadd.f32 %v3296_v17, %v452_v15  ;;  %v3344_v21 = vadd.f32 %v2583_v14, %v3111_v20 }
 0x11f   : > { %v2315_v22 = vpop.f32.mrf.mxu0 }
 0x120   : > { %2590 = vtanh.f32 %v453_v16  ;;  %v639_v25 = vpack.c.bf16 %v3344_v21, %v3341_v18 }
 0x121   : > { %v457_v9 = vpop.f32.mrf.mxu0  ;;  %v2585_v34 = vpop.eup %2584 }
 0x122   : > { %v458_v10 = vadd.f32 %v3296_v17, %v457_v9  ;;  %2397 = vmatmul.mubr.bf16.gmra.mxu1 %v639_v25  ;;  %v3353_v41 = vadd.f32 %v2585_v34, %v3123_v23 }
 0x123   : > { %v2318_v37 = vpop.f32.mrf.mxu0  ;;  %2400 = vmatprep.mubr.msk.bf16.mxu1 %vm2967_vm0, %v2966_v1 }
 0x124   : > { %2592 = vtanh.f32 %v458_v10 }
 0x125   : > { %v2587_v38 = vpop.eup %2586  ;;  %v460_v19 = vpop.f32.mrf.mxu0 }
 0x126   : > { %v461_v20 = vadd.f32 %v3296_v17, %v460_v19  ;;  %v3356_v42 = vadd.f32 %v2587_v38, %v3126_v24 }
 0x127   : > { %v2319_v43 = vpop.f32.mrf.mxu0 }
 0x128   : > { %2594 = vtanh.f32 %v461_v20  ;;  %v640_v46 = vpack.c.bf16 %v3356_v42, %v3353_v41 }
 0x129   : > { %v465_v12 = vpop.f32.mrf.mxu0  ;;  %v2589_v51 = vpop.eup %2588 }
 0x12a   : > { %v466_v13 = vadd.f32 %v3296_v17, %v465_v12  ;;  %2401 = vmatmul.mubr.bf16.gmra.mxu1 %v640_v46  ;;  %v3365_v58 = vadd.f32 %v2589_v51, %v3133_v26 }
 0x12b   : > { %v2322_v52 = vpop.f32.mrf.mxu0  ;;  %2404 = vmatprep.mubr.msk.bf16.mxu1 %vm2967_vm0, %v2966_v1 }
 0x12c   : > { %2596 = vtanh.f32 %v466_v13 }
 0x12d   : > { %v2591_v55 = vpop.eup %2590  ;;  %v468_v23 = vpop.f32.mrf.mxu0 }
 0x12e   : > { %v469_v24 = vadd.f32 %v3296_v17, %v468_v23  ;;  %v3368_v4 = vadd.f32 %v2591_v55, %v3136_v27 }
 0x12f   : > { %v2323_v7 = vpop.f32.mrf.mxu0 }
 0x130   : > { %2598 = vtanh.f32 %v469_v24  ;;  %v641_v14 = vpack.c.bf16 %v3368_v4, %v3365_v58 }
 0x131   : > { %v473_v15 = vpop.f32.mrf.mxu0  ;;  %v2593_v22 = vpop.eup %2592 }
 0x132   : > { %v474_v16 = vadd.f32 %v3296_v17, %v473_v15  ;;  %2405 = vmatmul.mubr.bf16.gmra.mxu1 %v641_v14  ;;  %v3377_v10 = vadd.f32 %v2593_v22, %v3143_v29 }
 0x133   : > { %v2326_v25 = vpop.f32.mrf.mxu0  ;;  %2408 = vmatprep.mubr.msk.bf16.mxu1 %vm2967_vm0, %v2966_v1 }
 0x134   : > { %2600 = vtanh.f32 %v474_v16 }
 0x135   : > { %v2595_v9 = vpop.eup %2594  ;;  %v476_v26 = vpop.f32.mrf.mxu0 }
 0x136   : > { %v477_v27 = vadd.f32 %v3296_v17, %v476_v26  ;;  %v3380_v34 = vadd.f32 %v2595_v9, %v3146_v30 }
 0x137   : > { %v2327_v37 = vpop.f32.mrf.mxu0 }
 0x138   : > { %2602 = vtanh.f32 %v477_v27  ;;  %v642_v38 = vpack.c.bf16 %v3380_v34, %v3377_v10 }
 0x139   : > { %v481_v19 = vpop.f32.mrf.mxu0  ;;  %v2597_v43 = vpop.eup %2596 }
 0x13a   : > { %v482_v20 = vadd.f32 %v3296_v17, %v481_v19  ;;  %2409 = vmatmul.mubr.bf16.gmra.mxu1 %v642_v38  ;;  %v3389_v13 = vadd.f32 %v2597_v43, %v3153_v32 }
 0x13b   : > { %v2330_v46 = vpop.f32.mrf.mxu0  ;;  %2412 = vmatprep.mubr.msk.bf16.mxu1 %vm2967_vm0, %v2966_v1 }
 0x13c   : > { %2604 = vtanh.f32 %v482_v20 }
 0x13d   : > { %v2599_v12 = vpop.eup %2598  ;;  %v484_v29 = vpop.f32.mrf.mxu0 }
 0x13e   : > { %v485_v30 = vadd.f32 %v3296_v17, %v484_v29  ;;  %v3392_v51 = vadd.f32 %v2599_v12, %v3156_v33 }
 0x13f   : > { %v2331_v52 = vpop.f32.mrf.mxu0 }
 0x140   : > { %2606 = vtanh.f32 %v485_v30  ;;  %v643_v55 = vpack.c.bf16 %v3392_v51, %v3389_v13 }
 0x141   : > { %v489_v23 = vpop.f32.mrf.mxu0  ;;  %v2601_v7 = vpop.eup %2600 }
 0x142   : > { %v490_v24 = vadd.f32 %v3296_v17, %v489_v23  ;;  %2413 = vmatmul.mubr.bf16.gmra.mxu1 %v643_v55  ;;  %v3401_v16 = vadd.f32 %v2601_v7, %v3163_v35 }
 0x143   : > { %v2334_v14 = vpop.f32.mrf.mxu0  ;;  %2416 = vmatprep.mubr.msk.bf16.mxu1 %vm2967_vm0, %v2966_v1 }
 0x144   : > { %2608 = vtanh.f32 %v490_v24 }
 0x145   : > { %v2603_v15 = vpop.eup %2602  ;;  %v492_v32 = vpop.f32.mrf.mxu0 }
 0x146   : > { %v493_v33 = vadd.f32 %v3296_v17, %v492_v32  ;;  %v3404_v22 = vadd.f32 %v2603_v15, %v3166_v36 }
 0x147   : > { %v2335_v25 = vpop.f32.mrf.mxu0 }
 0x148   : > { %2610 = vtanh.f32 %v493_v33  ;;  %v644_v9 = vpack.c.bf16 %v3404_v22, %v3401_v16 }
 0x149   : > { %v497_v26 = vpop.f32.mrf.mxu0  ;;  %v2605_v37 = vpop.eup %2604 }
 0x14a   : > { %v498_v27 = vadd.f32 %v3296_v17, %v497_v26  ;;  %2417 = vmatmul.mubr.bf16.gmra.mxu1 %v644_v9  ;;  %v3413_v20 = vadd.f32 %v2605_v37, %v3176_v39 }
 0x14b   : > { %v2338_v38 = vpop.f32.mrf.mxu0  ;;  %2420 = vmatprep.mubr.msk.bf16.mxu1 %vm2967_vm0, %v2966_v1 }
 0x14c   : > { %2612 = vtanh.f32 %v498_v27 }
 0x14d   : > { %v2607_v19 = vpop.eup %2606  ;;  %v500_v35 = vpop.f32.mrf.mxu0 }
 0x14e   : > { %v501_v36 = vadd.f32 %v3296_v17, %v500_v35  ;;  %v3416_v43 = vadd.f32 %v2607_v19, %v3179_v40 }
 0x14f   : > { %v2339_v46 = vpop.f32.mrf.mxu0 }
 0x150   : > { %2614 = vtanh.f32 %v501_v36  ;;  %v645_v12 = vpack.c.bf16 %v3416_v43, %v3413_v20 }
 0x151   : > { %v505_v29 = vpop.f32.mrf.mxu0  ;;  %v2609_v52 = vpop.eup %2608 }
 0x152   : > { %v506_v30 = vadd.f32 %v3296_v17, %v505_v29  ;;  %2421 = vmatmul.mubr.bf16.gmra.mxu1 %v645_v12  ;;  %v3425_v24 = vadd.f32 %v2609_v52, %v3194_v44 }
 0x153   : > { %v2342_v55 = vpop.f32.mrf.mxu0  ;;  %2424 = vmatprep.mubr.msk.bf16.mxu1 %vm2967_vm0, %v2966_v1 }
 0x154   : > { %2616 = vtanh.f32 %v506_v30 }
 0x155   : > { %v2611_v23 = vpop.eup %2610  ;;  %v508_v39 = vpop.f32.mrf.mxu0 }
 0x156   : > { %v509_v40 = vadd.f32 %v3296_v17, %v508_v39  ;;  %v3428_v7 = vadd.f32 %v2611_v23, %v3197_v45 }
 0x157   : > { %v2343_v14 = vpop.f32.mrf.mxu0 }
 0x158   : > { %2618 = vtanh.f32 %v509_v40  ;;  %v646_v15 = vpack.c.bf16 %v3428_v7, %v3425_v24 }
 0x159   : > { %v513_v32 = vpop.f32.mrf.mxu0  ;;  %v2613_v25 = vpop.eup %2612 }
 0x15a   : > { %v514_v33 = vadd.f32 %v3296_v17, %v513_v32  ;;  %2425 = vmatmul.mubr.bf16.gmra.mxu1 %v646_v15  ;;  %v3437_v27 = vadd.f32 %v2613_v25, %v3212_v49 }
 0x15b   : > { %v2346_v9 = vpop.f32.mrf.mxu0  ;;  %2428 = vmatprep.mubr.msk.bf16.mxu1 %vm2967_vm0, %v2966_v1 }
 0x15c   : > { %2620 = vtanh.f32 %v514_v33 }
 0x15d   : > { %v2615_v26 = vpop.eup %2614  ;;  %v516_v44 = vpop.f32.mrf.mxu0 }
 0x15e   : > { %v517_v45 = vadd.f32 %v3296_v17, %v516_v44  ;;  %v3440_v37 = vadd.f32 %v2615_v26, %v3215_v50 }
 0x15f   : > { %v2347_v38 = vpop.f32.mrf.mxu0 }
 0x160   : > { %2622 = vtanh.f32 %v517_v45  ;;  %v647_v19 = vpack.c.bf16 %v3440_v37, %v3437_v27 }
 0x161   : > { %v521_v35 = vpop.f32.mrf.mxu0  ;;  %v2617_v46 = vpop.eup %2616 }
 0x162   : > { %v522_v36 = vadd.f32 %v3296_v17, %v521_v35  ;;  %2429 = vmatmul.mubr.bf16.gmra.mxu1 %v647_v19  ;;  %v3449_v30 = vadd.f32 %v2617_v46, %v3226_v53 }
 0x163   : > { %v2350_v12 = vpop.f32.mrf.mxu0  ;;  %2432 = vmatprep.mubr.msk.bf16.mxu1 %vm2967_vm0, %v2966_v1 }
 0x164   : > { %2624 = vtanh.f32 %v522_v36 }
 0x165   : > { %v2619_v29 = vpop.eup %2618  ;;  %v524_v49 = vpop.f32.mrf.mxu0 }
 0x166   : > { %v525_v50 = vadd.f32 %v3296_v17, %v524_v49  ;;  %v3452_v52 = vadd.f32 %v2619_v29, %v3229_v54 }
 0x167   : > { %v2351_v55 = vpop.f32.mrf.mxu0 }
 0x168   : > { %2626 = vtanh.f32 %v525_v50  ;;  %v648_v23 = vpack.c.bf16 %v3452_v52, %v3449_v30 }
 0x169   : > { %v529_v39 = vpop.f32.mrf.mxu0  ;;  %v2621_v14 = vpop.eup %2620 }
 0x16a   : > { %v530_v40 = vadd.f32 %v3296_v17, %v529_v39  ;;  %2433 = vmatmul.mubr.bf16.gmra.mxu1 %v648_v23  ;;  %v3461_v33 = vadd.f32 %v2621_v14, %v3236_v56 }
 0x16b   : > { %v2354_v15 = vpop.f32.mrf.mxu0  ;;  %2436 = vmatprep.mubr.msk.bf16.mxu1 %vm2967_vm0, %v2966_v1 }
 0x16c   : > { %2628 = vtanh.f32 %v530_v40 }
 0x16d   : > { %v2623_v32 = vpop.eup %2622  ;;  %v532_v53 = vpop.f32.mrf.mxu0 }
 0x16e   : > { %v533_v54 = vadd.f32 %v3296_v17, %v532_v53  ;;  %v3464_v25 = vadd.f32 %v2623_v32, %v3239_v57 }
 0x16f   : > { %v2355_v9 = vpop.f32.mrf.mxu0 }
 0x170   : > { %2630 = vtanh.f32 %v533_v54  ;;  %v649_v26 = vpack.c.bf16 %v3464_v25, %v3461_v33 }
 0x171   : > { %v537_v44 = vpop.f32.mrf.mxu0  ;;  %v2625_v38 = vpop.eup %2624 }
 0x172   : > { %v538_v45 = vadd.f32 %v3296_v17, %v537_v44  ;;  %2437 = vmatmul.mubr.bf16.gmra.mxu1 %v649_v26  ;;  %v3473_v36 = vadd.f32 %v2625_v38, %v3246_v59 }
 0x173   : > { %v2358_v19 = vpop.f32.mrf.mxu0  ;;  %2440 = vmatprep.mubr.msk.bf16.mxu1 %vm2967_vm0, %v2966_v1 }
 0x174   : > { %2632 = vtanh.f32 %v538_v45 }
 0x175   : > { %v2627_v35 = vpop.eup %2626  ;;  %v540_v56 = vpop.f32.mrf.mxu0 }
 0x176   : > { %v541_v57 = vadd.f32 %v3296_v17, %v540_v56  ;;  %v3476_v46 = vadd.f32 %v2627_v35, %v3249_v60 }
 0x177   : > { %v2359_v12 = vpop.f32.mrf.mxu0 }
 0x178   : > { %2634 = vtanh.f32 %v541_v57  ;;  %v650_v29 = vpack.c.bf16 %v3476_v46, %v3473_v36 }
 0x179   : > { %v545_v49 = vpop.f32.mrf.mxu0  ;;  %v2629_v55 = vpop.eup %2628 }
 0x17a   : > { %v546_v50 = vadd.f32 %v3296_v17, %v545_v49  ;;  %2441 = vmatmul.mubr.bf16.gmra.mxu1 %v650_v29  ;;  %v3485_v40 = vadd.f32 %v2629_v55, %v3256_v62 }
 0x17b   : > { %v2362_v23 = vpop.f32.mrf.mxu0  ;;  %2444 = vmatprep.mubr.msk.bf16.mxu1 %vm2967_vm0, %v2966_v1 }
 0x17c   : > { %2636 = vtanh.f32 %v546_v50 }
 0x17d   : > { %v2631_v39 = vpop.eup %2630  ;;  %v548_v59 = vpop.f32.mrf.mxu0 }
 0x17e   : > { %v549_v60 = vadd.f32 %v3296_v17, %v548_v59  ;;  %v3488_v14 = vadd.f32 %v2631_v39, %v3259_v63 }
 0x17f   : > { %v2363_v15 = vpop.f32.mrf.mxu0 }
 0x180   : > { %2638 = vtanh.f32 %v549_v60  ;;  %v651_v32 = vpack.c.bf16 %v3488_v14, %v3485_v40 }
 0x181   : > { %v553_v53 = vpop.f32.mrf.mxu0  ;;  %v2633_v9 = vpop.eup %2632 }
 0x182   : > { %v554_v54 = vadd.f32 %v3296_v17, %v553_v53  ;;  %2445 = vmatmul.mubr.bf16.gmra.mxu1 %v651_v32  ;;  %v3497_v45 = vadd.f32 %v2633_v9, %v3266_v2 }
 0x183   : > { %v2366_v26 = vpop.f32.mrf.mxu0  ;;  %2448 = vmatprep.mubr.msk.bf16.mxu1 %vm2967_vm0, %v2966_v1 }
 0x184   : > { %2640 = vtanh.f32 %v554_v54 }
 0x185   : > { %v2635_v44 = vpop.eup %2634  ;;  %v556_v62 = vpop.f32.mrf.mxu0 }
 0x186   : > { %v557_v63 = vadd.f32 %v3296_v17, %v556_v62  ;;  %v3500_v38 = vadd.f32 %v2635_v44, %v3269_v3 }
 0x187   : > { %v2367_v19 = vpop.f32.mrf.mxu0 }
 0x188   : > { %2642 = vtanh.f32 %v557_v63  ;;  %v652_v35 = vpack.c.bf16 %v3500_v38, %v3497_v45 }
 0x189   : > { %v2637_v56 = vpop.eup %2636 }
 0x18a   : > { %2449 = vmatmul.mubr.bf16.gmra.mxu1 %v652_v35  ;;  %v3507_v12 = vadd.f32 %v2637_v56, %v3276_v5 }
 0x18b   : > { %2452 = vmatprep.mubr.msk.bf16.mxu1 %vm2967_vm0, %v2966_v1 }
 0x18d   : > { %v2639_v57 = vpop.eup %2638 }
 0x18e   : > { %v3510_v2 = vadd.f32 %v2639_v57, %v3279_v6  ;;  %v3527_v6 = vld [vmem:[%s4481_s2 + $0x1] ss:$0 sm:$0xff] }
 0x190   : > { %v653_v3 = vpack.c.bf16 %v3510_v2, %v3507_v12 }
 0x191   : > { %v2641_v17 = vpop.eup %2640 }
 0x192   : > { %2453 = vmatmul.mubr.bf16.gmra.mxu1 %v653_v3  ;;  %v3517_v49 = vadd.f32 %v2641_v17, %v3286_v8 }
 0x193   : > { %2456 = vmatprep.mubr.msk.bf16.mxu1 %vm2967_vm0, %v2966_v1 }
 0x195   : > { %v2643_v29 = vpop.eup %2642 }
 0x196   : > { %v3520_v50 = vadd.f32 %v2643_v29, %v3289_v11 }
 0x198   : > { %v654_v5 = vpack.c.bf16 %v3520_v50, %v3517_v49 }
 0x19a   : > { %2457 = vmatmul.mubr.bf16.gmra.mxu1 %v654_v5 }
 0x1ca   : > { %v762_v55 = vpop.f32.mrf.mxu1 }
 0x1cb   : > { %v763_v23 = vadd.f32 %v3527_v6, %v762_v55 }
 0x1cc   : > { %v2386_v1 = vpop.f32.mrf.mxu1 }
 0x1cd   : > { %2644 = vtanh.f32 %v763_v23 }
 0x1ce   : > { %v765_v39 = vpop.f32.mrf.mxu1 }
 0x1cf   : > { %v766_v8 = vadd.f32 %v3527_v6, %v765_v39 }
 0x1d0   : > { %v2387_v59 = vpop.f32.mrf.mxu1 }
 0x1d1   : > { %2646 = vtanh.f32 %v766_v8 }
 0x1d2   : > { %v770_v11 = vpop.f32.mrf.mxu1 }
 0x1d3   : > { %v771_v60 = vadd.f32 %v3527_v6, %v770_v11 }
 0x1d4   : > { %v2390_v15 = vpop.f32.mrf.mxu1 }
 0x1d5   : > { %2648 = vtanh.f32 %v771_v60 }
 0x1d6   : > { %v773_v32 = vpop.f32.mrf.mxu1 }
 0x1d7   : > { %v774_v53 = vadd.f32 %v3527_v6, %v773_v32 }
 0x1d8   : > { %v2391_v54 = vpop.f32.mrf.mxu1 }
 0x1d9   : > { %2650 = vtanh.f32 %v774_v53 }
 0x1da   : > { %v2645_v9 = vpop.eup %2644  ;;  %v778_v26 = vpop.f32.mrf.mxu1 }
 0x1db   : > { %v779_v44 = vadd.f32 %v3527_v6, %v778_v26  ;;  %v3535_v62 = vadd.f32 %v2645_v9, %v3305_v61 }
 0x1dc   : > { %v2394_v63 = vpop.f32.mrf.mxu1 }
 0x1dd   : > { %2652 = vtanh.f32 %v779_v44  ;;  %989 = vadd.xlane.f32.xlu0 %v3535_v62 }
 0x1de   : > { %v2647_v19 = vpop.eup %2646  ;;  %v781_v35 = vpop.f32.mrf.mxu1 }
 0x1df   : > { %v782_v56 = vadd.f32 %v3527_v6, %v781_v35  ;;  %v3540_v57 = vadd.f32 %v2647_v19, %v3308_v0 }
 0x1e0   : > { %v2395_v3 = vpop.f32.mrf.mxu1 }
 0x1e1   : > { %2654 = vtanh.f32 %v782_v56  ;;  %991 = vadd.xlane.f32.xlu0 %v3540_v57 }
 0x1e2   : > { %v2649_v17 = vpop.eup %2648  ;;  %v786_v29 = vpop.f32.mrf.mxu1 }
 0x1e3   : > { %v787_v61 = vadd.f32 %v3527_v6, %v786_v29  ;;  %v3545_v5 = vadd.f32 %v2649_v17, %v3317_v28 }
 0x1e4   : > { %v2398_v55 = vpop.f32.mrf.mxu1 }
 0x1e5   : > { %2656 = vtanh.f32 %v787_v61  ;;  %993 = vadd.xlane.f32.xlu1 %v3545_v5 }
 0x1e6   : > { %v2651_v23 = vpop.eup %2650  ;;  %v789_v1 = vpop.f32.mrf.mxu1 }
 0x1e7   : > { %v790_v0 = vadd.f32 %v3527_v6, %v789_v1  ;;  %v3550_v39 = vadd.f32 %v2651_v23, %v3320_v31 }
 0x1e8   : > { %v2399_v8 = vpop.f32.mrf.mxu1 }
 0x1e9   : > { %2658 = vtanh.f32 %v790_v0  ;;  %995 = vadd.xlane.f32.xlu1 %v3550_v39 }
 0x1ea   : > { %v2653_v59 = vpop.eup %2652  ;;  %v794_v11 = vpop.f32.mrf.mxu1 }
 0x1eb   : > { %v795_v28 = vadd.f32 %v3527_v6, %v794_v11  ;;  %v3555_v60 = vadd.f32 %v2653_v59, %v3329_v47 }
 0x1ec   : > { %v2402_v15 = vpop.f32.mrf.mxu1 }
 0x1ed   : > { %2660 = vtanh.f32 %v795_v28  ;;  %997 = vadd.xlane.f32.xlu0 %v3555_v60 }
 0x1ee   : > { %v2655_v32 = vpop.eup %2654  ;;  %v797_v53 = vpop.f32.mrf.mxu1 }
 0x1ef   : > { %v798_v31 = vadd.f32 %v3527_v6, %v797_v53  ;;  %v3560_v54 = vadd.f32 %v2655_v32, %v3332_v48 }
 0x1f0   : > { %v2403_v9 = vpop.f32.mrf.mxu1 }
 0x1f1   : > { %2662 = vtanh.f32 %v798_v31  ;;  %999 = vadd.xlane.f32.xlu1 %v3560_v54 }
 0x1f2   : > { %v2657_v26 = vpop.eup %2656  ;;  %v802_v44 = vpop.f32.mrf.mxu1 }
 0x1f3   : > { %v803_v47 = vadd.f32 %v3527_v6, %v802_v44  ;;  %v3565_v63 = vadd.f32 %v2657_v26, %v3341_v18 }
 0x1f4   : > { %v2406_v19 = vpop.f32.mrf.mxu1 }
 0x1f5   : > { %2664 = vtanh.f32 %v803_v47  ;;  %1001 = vadd.xlane.f32.xlu0 %v3565_v63 }
 0x1f6   : > { %v2659_v35 = vpop.eup %2658  ;;  %v805_v56 = vpop.f32.mrf.mxu1 }
 0x1f7   : > { %v806_v48 = vadd.f32 %v3527_v6, %v805_v56  ;;  %v3570_v3 = vadd.f32 %v2659_v35, %v3344_v21 }
 0x1f8   : > { %v2407_v17 = vpop.f32.mrf.mxu1 }
 0x1f9   : > { %2666 = vtanh.f32 %v806_v48  ;;  %1003 = vadd.xlane.f32.xlu1 %v3570_v3 }
 0x1fa   : > { %v2661_v29 = vpop.eup %2660  ;;  %v810_v61 = vpop.f32.mrf.mxu1 }
 0x1fb   : > { %v811_v18 = vadd.f32 %v3527_v6, %v810_v61  ;;  %v3575_v55 = vadd.f32 %v2661_v29, %v3353_v41 }
 0x1fc   : > { %v2410_v23 = vpop.f32.mrf.mxu1 }
 0x1fd   : > { %2668 = vtanh.f32 %v811_v18  ;;  %1005 = vadd.xlane.f32.xlu0 %v3575_v55 }
 0x1fe   : > { %v2663_v1 = vpop.eup %2662  ;;  %v813_v0 = vpop.f32.mrf.mxu1 }
 0x1ff   : > { %v814_v21 = vadd.f32 %v3527_v6, %v813_v0  ;;  %v3580_v8 = vadd.f32 %v2663_v1, %v3356_v42 }
 0x200   : > { %v2411_v59 = vpop.f32.mrf.mxu1 }
 0x201   : > { %2670 = vtanh.f32 %v814_v21  ;;  %1007 = vadd.xlane.f32.xlu1 %v3580_v8 }
 0x202   : > { %v2665_v11 = vpop.eup %2664  ;;  %v818_v28 = vpop.f32.mrf.mxu1 }
 0x203   : > { %v819_v41 = vadd.f32 %v3527_v6, %v818_v28  ;;  %v3585_v15 = vadd.f32 %v2665_v11, %v3365_v58 }
 0x204   : > { %v2414_v32 = vpop.f32.mrf.mxu1 }
 0x205   : > { %2672 = vtanh.f32 %v819_v41  ;;  %1009 = vadd.xlane.f32.xlu0 %v3585_v15 }
 0x206   : > { %v2667_v53 = vpop.eup %2666  ;;  %v821_v31 = vpop.f32.mrf.mxu1 }
 0x207   : > { %v822_v42 = vadd.f32 %v3527_v6, %v821_v31  ;;  %v3590_v9 = vadd.f32 %v2667_v53, %v3368_v4 }
 0x208   : > { %v2415_v26 = vpop.f32.mrf.mxu1 }
 0x209   : > { %2674 = vtanh.f32 %v822_v42  ;;  %1011 = vadd.xlane.f32.xlu1 %v3590_v9 }
 0x20a   : > { %v2669_v44 = vpop.eup %2668  ;;  %v826_v47 = vpop.f32.mrf.mxu1 }
 0x20b   : > { %v827_v58 = vadd.f32 %v3527_v6, %v826_v47  ;;  %v3595_v19 = vadd.f32 %v2669_v44, %v3377_v10 }
 0x20c   : > { %v2418_v35 = vpop.f32.mrf.mxu1 }
 0x20d   : > { %2676 = vtanh.f32 %v827_v58  ;;  %1013 = vadd.xlane.f32.xlu0 %v3595_v19 }
 0x20e   : > { %v2671_v56 = vpop.eup %2670  ;;  %v829_v48 = vpop.f32.mrf.mxu1 }
 0x20f   : > { %v830_v4 = vadd.f32 %v3527_v6, %v829_v48  ;;  %v3600_v17 = vadd.f32 %v2671_v56, %v3380_v34 }
 0x210   : > { %v2419_v29 = vpop.f32.mrf.mxu1 }
 0x211   : > { %2678 = vtanh.f32 %v830_v4  ;;  %1015 = vadd.xlane.f32.xlu1 %v3600_v17 }
 0x212   : > { %v2673_v61 = vpop.eup %2672  ;;  %v834_v18 = vpop.f32.mrf.mxu1 }
 0x213   : > { %v835_v10 = vadd.f32 %v3527_v6, %v834_v18  ;;  %v3605_v23 = vadd.f32 %v2673_v61, %v3389_v13 }
 0x214   : > { %v2422_v1 = vpop.f32.mrf.mxu1 }
 0x215   : > { %2680 = vtanh.f32 %v835_v10  ;;  %1017 = vadd.xlane.f32.xlu0 %v3605_v23 }
 0x216   : > { %v2675_v0 = vpop.eup %2674  ;;  %v837_v21 = vpop.f32.mrf.mxu1 }
 0x217   : > { %v838_v34 = vadd.f32 %v3527_v6, %v837_v21  ;;  %v3610_v59 = vadd.f32 %v2675_v0, %v3392_v51 }
 0x218   : > { %v2423_v11 = vpop.f32.mrf.mxu1 }
 0x219   : > { %2682 = vtanh.f32 %v838_v34  ;;  %1019 = vadd.xlane.f32.xlu1 %v3610_v59 }
 0x21a   : > { %v2677_v28 = vpop.eup %2676  ;;  %v842_v41 = vpop.f32.mrf.mxu1 }
 0x21b   : > { %v843_v13 = vadd.f32 %v3527_v6, %v842_v41  ;;  %v3615_v32 = vadd.f32 %v2677_v28, %v3401_v16 }
 0x21c   : > { %v2426_v53 = vpop.f32.mrf.mxu1 }
 0x21d   : > { %2684 = vtanh.f32 %v843_v13  ;;  %1021 = vadd.xlane.f32.xlu0 %v3615_v32 }
 0x21e   : > { %v2679_v31 = vpop.eup %2678  ;;  %v845_v42 = vpop.f32.mrf.mxu1 }
 0x21f   : > { %v846_v51 = vadd.f32 %v3527_v6, %v845_v42  ;;  %v3620_v26 = vadd.f32 %v2679_v31, %v3404_v22 }
 0x220   : > { %v2427_v44 = vpop.f32.mrf.mxu1 }
 0x221   : > { %2686 = vtanh.f32 %v846_v51  ;;  %1023 = vadd.xlane.f32.xlu1 %v3620_v26 }
 0x222   : > { %v2681_v47 = vpop.eup %2680  ;;  %v850_v58 = vpop.f32.mrf.mxu1 }
 0x223   : > { %v851_v16 = vadd.f32 %v3527_v6, %v850_v58  ;;  %v3625_v35 = vadd.f32 %v2681_v47, %v3413_v20 }
 0x224   : > { %v2430_v56 = vpop.f32.mrf.mxu1 }
 0x225   : > { %2688 = vtanh.f32 %v851_v16  ;;  %1025 = vadd.xlane.f32.xlu0 %v3625_v35 }
 0x226   : > { %v2683_v48 = vpop.eup %2682  ;;  %v853_v4 = vpop.f32.mrf.mxu1 }
 0x227   : > { %v854_v22 = vadd.f32 %v3527_v6, %v853_v4  ;;  %v3630_v29 = vadd.f32 %v2683_v48, %v3416_v43 }
 0x228   : > { %v2431_v61 = vpop.f32.mrf.mxu1 }
 0x229   : > { %2690 = vtanh.f32 %v854_v22  ;;  %1027 = vadd.xlane.f32.xlu1 %v3630_v29 }
 0x22a   : > { %v2685_v18 = vpop.eup %2684  ;;  %v858_v10 = vpop.f32.mrf.mxu1 }
 0x22b   : > { %v859_v20 = vadd.f32 %v3527_v6, %v858_v10  ;;  %v3635_v1 = vadd.f32 %v2685_v18, %v3425_v24 }
 0x22c   : > { %v2434_v0 = vpop.f32.mrf.mxu1 }
 0x22d   : > { %2692 = vtanh.f32 %v859_v20  ;;  %1029 = vadd.xlane.f32.xlu0 %v3635_v1 }
 0x22e   : > { %v2687_v21 = vpop.eup %2686  ;;  %v861_v34 = vpop.f32.mrf.mxu1 }
 0x22f   : > { %v862_v43 = vadd.f32 %v3527_v6, %v861_v34  ;;  %v3640_v11 = vadd.f32 %v2687_v21, %v3428_v7 }
 0x230   : > { %v2435_v28 = vpop.f32.mrf.mxu1 }
 0x231   : > { %2694 = vtanh.f32 %v862_v43  ;;  %1031 = vadd.xlane.f32.xlu1 %v3640_v11 }
 0x232   : > { %v2689_v41 = vpop.eup %2688  ;;  %v866_v13 = vpop.f32.mrf.mxu1 }
 0x233   : > { %v867_v24 = vadd.f32 %v3527_v6, %v866_v13  ;;  %v3645_v53 = vadd.f32 %v2689_v41, %v3437_v27 }
 0x234   : > { %v2438_v31 = vpop.f32.mrf.mxu1 }
 0x235   : > { %2696 = vtanh.f32 %v867_v24  ;;  %1033 = vadd.xlane.f32.xlu0 %v3645_v53 }
 0x236   : > { %v2691_v42 = vpop.eup %2690  ;;  %v869_v51 = vpop.f32.mrf.mxu1 }
 0x237   : > { %v870_v7 = vadd.f32 %v3527_v6, %v869_v51  ;;  %v3650_v44 = vadd.f32 %v2691_v42, %v3440_v37 }
 0x238   : > { %v2439_v47 = vpop.f32.mrf.mxu1 }
 0x239   : > { %2698 = vtanh.f32 %v870_v7  ;;  %1035 = vadd.xlane.f32.xlu1 %v3650_v44 }
 0x23a   : > { %v2693_v58 = vpop.eup %2692  ;;  %v874_v16 = vpop.f32.mrf.mxu1 }
 0x23b   : > { %v875_v27 = vadd.f32 %v3527_v6, %v874_v16  ;;  %v3655_v56 = vadd.f32 %v2693_v58, %v3449_v30 }
 0x23c   : > { %v2442_v48 = vpop.f32.mrf.mxu1 }
 0x23d   : > { %2700 = vtanh.f32 %v875_v27  ;;  %1037 = vadd.xlane.f32.xlu0 %v3655_v56 }
 0x23e   : > { %v2695_v4 = vpop.eup %2694  ;;  %v877_v22 = vpop.f32.mrf.mxu1 }
 0x23f   : > { %v878_v37 = vadd.f32 %v3527_v6, %v877_v22  ;;  %v3660_v61 = vadd.f32 %v2695_v4, %v3452_v52 }
 0x240   : > { %v2443_v18 = vpop.f32.mrf.mxu1 }
 0x241   : > { %2702 = vtanh.f32 %v878_v37  ;;  %1039 = vadd.xlane.f32.xlu1 %v3660_v61 }
 0x242   : > { %v2697_v10 = vpop.eup %2696  ;;  %v882_v20 = vpop.f32.mrf.mxu1 }
 0x243   : > { %v883_v30 = vadd.f32 %v3527_v6, %v882_v20  ;;  %v3665_v0 = vadd.f32 %v2697_v10, %v3461_v33 }
 0x244   : > { %v2446_v21 = vpop.f32.mrf.mxu1 }
 0x245   : > { %2704 = vtanh.f32 %v883_v30  ;;  %1041 = vadd.xlane.f32.xlu0 %v3665_v0 }
 0x246   : > { %v2699_v34 = vpop.eup %2698  ;;  %v885_v43 = vpop.f32.mrf.mxu1 }
 0x247   : > { %v886_v52 = vadd.f32 %v3527_v6, %v885_v43  ;;  %v3670_v28 = vadd.f32 %v2699_v34, %v3464_v25 }
 0x248   : > { %v2447_v41 = vpop.f32.mrf.mxu1 }
 0x249   : > { %2706 = vtanh.f32 %v886_v52  ;;  %1043 = vadd.xlane.f32.xlu1 %v3670_v28 }
 0x24a   : > { %v2701_v13 = vpop.eup %2700  ;;  %v890_v24 = vpop.f32.mrf.mxu1 }
 0x24b   : > { %v891_v33 = vadd.f32 %v3527_v6, %v890_v24  ;;  %v3675_v31 = vadd.f32 %v2701_v13, %v3473_v36 }
 0x24c   : > { %v2450_v42 = vpop.f32.mrf.mxu1 }
 0x24d   : > { %2708 = vtanh.f32 %v891_v33  ;;  %1045 = vadd.xlane.f32.xlu0 %v3675_v31 }
 0x24e   : > { %v2703_v51 = vpop.eup %2702  ;;  %v893_v7 = vpop.f32.mrf.mxu1 }
 0x24f   : > { %v894_v25 = vadd.f32 %v3527_v6, %v893_v7  ;;  %v3680_v47 = vadd.f32 %v2703_v51, %v3476_v46 }
 0x250   : > { %v2451_v58 = vpop.f32.mrf.mxu1 }
 0x251   : > { %2710 = vtanh.f32 %v894_v25  ;;  %1047 = vadd.xlane.f32.xlu1 %v3680_v47 }
 0x252   : > { %v2705_v16 = vpop.eup %2704  ;;  %v898_v27 = vpop.f32.mrf.mxu1 }
 0x253   : > { %v899_v36 = vadd.f32 %v3527_v6, %v898_v27  ;;  %v3685_v48 = vadd.f32 %v2705_v16, %v3485_v40 }
 0x254   : > { %v2454_v4 = vpop.f32.mrf.mxu1 }
 0x255   : > { %2712 = vtanh.f32 %v899_v36  ;;  %1049 = vadd.xlane.f32.xlu0 %v3685_v48 }
 0x256   : > { %v2707_v22 = vpop.eup %2706  ;;  %v901_v37 = vpop.f32.mrf.mxu1 }
 0x257   : > { %v902_v46 = vadd.f32 %v3527_v6, %v901_v37  ;;  %v3690_v18 = vadd.f32 %v2707_v22, %v3488_v14 }
 0x258   : > { %v2455_v10 = vpop.f32.mrf.mxu1 }
 0x259   : > { %2714 = vtanh.f32 %v902_v46  ;;  %1051 = vadd.xlane.f32.xlu1 %v3690_v18 }
 0x25a   : > { %v2709_v20 = vpop.eup %2708  ;;  %v906_v30 = vpop.f32.mrf.mxu1 }
 0x25b   : > { %v907_v40 = vadd.f32 %v3527_v6, %v906_v30  ;;  %v3695_v21 = vadd.f32 %v2709_v20, %v3497_v45 }
 0x25c   : > { %v2458_v34 = vpop.f32.mrf.mxu1 }
 0x25d   : > { %2716 = vtanh.f32 %v907_v40  ;;  %1053 = vadd.xlane.f32.xlu0 %v3695_v21 }
 0x25e   : > { %v2711_v43 = vpop.eup %2710  ;;  %v909_v52 = vpop.f32.mrf.mxu1 }
 0x25f   : > { %v910_v14 = vadd.f32 %v3527_v6, %v909_v52  ;;  %v3700_v41 = vadd.f32 %v2711_v43, %v3500_v38 }
 0x260   : > { %v2459_v13 = vpop.f32.mrf.mxu1 }
 0x261   : > { %2718 = vtanh.f32 %v910_v14  ;;  %1055 = vadd.xlane.f32.xlu1 %v3700_v41 }
 0x262   : > { %v2713_v24 = vpop.eup %2712 }
 0x263   : > { %v3704_v33 = vadd.f32 %v2713_v24, %v3507_v12 }
 0x265   : > { %1057 = vadd.xlane.f32.xlu0 %v3704_v33 }
 0x266   : > { %v2715_v45 = vpop.eup %2714  ;;  %v990_v42 = vpop.xlane.xlu0 %989 }
 0x267   : > { %v1065_v51 = vmul.f32 0.0078125, %v990_v42  ;;  %v3708_v7 = vadd.f32 %v2715_v45, %v3510_v2 }
 0x269   : > { %1059 = vadd.xlane.f32.xlu1 %v3708_v7  ;;  %v3712_v25 = vsub.f32 %v3535_v62, %v1065_v51 }
 0x26a   : > { %v2717_v38 = vpop.eup %2716  ;;  %v992_v6 = vpop.xlane.xlu0 %991 }
 0x26b   : > { %v1066_v58 = vmul.f32 0.0078125, %v992_v6  ;;  %v3715_v16 = vadd.f32 %v2717_v38, %v3517_v49  ;;  %v1141_v4 = vmul.f32 %v3712_v25, %v3712_v25 }
 0x26d   : > { %1061 = vadd.xlane.f32.xlu0 %v3715_v16  ;;  %v3719_v36 = vsub.f32 %v3540_v57, %v1066_v58 }
 0x26e   : > { %v2719_v12 = vpop.eup %2718  ;;  %v994_v27 = vpop.xlane.xlu1 %993 }
 0x26f   : > { %v1067_v2 = vmul.f32 0.0078125, %v994_v27  ;;  %v3724_v22 = vadd.f32 %v2719_v12, %v3520_v50  ;;  %v1142_v57 = vmul.f32 %v3719_v36, %v3719_v36 }
 0x271   : > { %v3727_v62 = vsub.f32 %v3545_v5, %v1067_v2  ;;  %1179 = vadd.xlane.f32.xlu0 %v1141_v4  ;;  %1063 = vadd.xlane.f32.xlu1 %v3724_v22 }
 0x272   : > { %v996_v49 = vpop.xlane.xlu1 %995 }
 0x273   : > { %v1068_v37 = vmul.f32 0.0078125, %v996_v49  ;;  %v1143_v46 = vmul.f32 %v3727_v62, %v3727_v62 }
 0x275   : > { %v3735_v10 = vsub.f32 %v3550_v39, %v1068_v37  ;;  %1183 = vadd.xlane.f32.xlu0 %v1143_v46  ;;  %1181 = vadd.xlane.f32.xlu1 %v1142_v57 }
 0x276   : > { %v998_v50 = vpop.xlane.xlu0 %997 }
 0x277   : > { %v1069_v20 = vmul.f32 0.0078125, %v998_v50  ;;  %v1144_v5 = vmul.f32 %v3735_v10, %v3735_v10 }
 0x279   : > { %v3740_v30 = vsub.f32 %v3555_v60, %v1069_v20  ;;  %1185 = vadd.xlane.f32.xlu1 %v1144_v5 }
 0x27a   : > { %v1000_v40 = vpop.xlane.xlu1 %999 }
 0x27b   : > { %v1070_v34 = vmul.f32 0.0078125, %v1000_v40  ;;  %v1145_v43 = vmul.f32 %v3740_v30, %v3740_v30 }
 0x27d   : > { %v3745_v52 = vsub.f32 %v3560_v54, %v1070_v34  ;;  %1187 = vadd.xlane.f32.xlu0 %v1145_v43 }
 0x27e   : > { %v1002_v39 = vpop.xlane.xlu0 %1001 }
 0x27f   : > { %v1071_v14 = vmul.f32 0.0078125, %v1002_v39  ;;  %v1146_v13 = vmul.f32 %v3745_v52, %v3745_v52 }
 0x281   : > { %v3750_v24 = vsub.f32 %v3565_v63, %v1071_v14  ;;  %1189 = vadd.xlane.f32.xlu1 %v1146_v13 }
 0x282   : > { %v1004_v60 = vpop.xlane.xlu1 %1003 }
 0x283   : > { %v1072_v45 = vmul.f32 0.0078125, %v1004_v60  ;;  %v1147_v42 = vmul.f32 %v3750_v24, %v3750_v24 }
 0x285   : > { %v3755_v51 = vsub.f32 %v3570_v3, %v1072_v45  ;;  %1191 = vadd.xlane.f32.xlu0 %v1147_v42 }
 0x286   : > { %v1006_v54 = vpop.xlane.xlu0 %1005 }
 0x287   : > { %v1073_v38 = vmul.f32 0.0078125, %v1006_v54  ;;  %v1148_v6 = vmul.f32 %v3755_v51, %v3755_v51 }
 0x289   : > { %v3760_v58 = vsub.f32 %v3575_v55, %v1073_v38  ;;  %1193 = vadd.xlane.f32.xlu1 %v1148_v6 }
 0x28a   : > { %v1008_v63 = vpop.xlane.xlu1 %1007 }
 0x28b   : > { %v1074_v12 = vmul.f32 0.0078125, %v1008_v63  ;;  %v1149_v27 = vmul.f32 %v3760_v58, %v3760_v58 }
 0x28d   : > { %v3765_v2 = vsub.f32 %v3580_v8, %v1074_v12  ;;  %1195 = vadd.xlane.f32.xlu0 %v1149_v27 }
 0x28e   : > { %v1010_v3 = vpop.xlane.xlu0 %1009 }
 0x28f   : > { %v1075_v4 = vmul.f32 0.0078125, %v1010_v3  ;;  %v1150_v49 = vmul.f32 %v3765_v2, %v3765_v2 }
 0x291   : > { %v3770_v37 = vsub.f32 %v3585_v15, %v1075_v4  ;;  %1197 = vadd.xlane.f32.xlu1 %v1150_v49 }
 0x292   : > { %v1012_v55 = vpop.xlane.xlu1 %1011 }
 0x293   : > { %v1076_v46 = vmul.f32 0.0078125, %v1012_v55  ;;  %v1151_v57 = vmul.f32 %v3770_v37, %v3770_v37 }
 0x295   : > { %v3775_v50 = vsub.f32 %v3590_v9, %v1076_v46  ;;  %1199 = vadd.xlane.f32.xlu0 %v1151_v57 }
 0x296   : > { %v1014_v8 = vpop.xlane.xlu0 %1013 }
 0x297   : > { %v1077_v20 = vmul.f32 0.0078125, %v1014_v8  ;;  %v1152_v5 = vmul.f32 %v3775_v50, %v3775_v50 }
 0x299   : > { %v3780_v40 = vsub.f32 %v3595_v19, %v1077_v20  ;;  %1201 = vadd.xlane.f32.xlu1 %v1152_v5 }
 0x29a   : > { %v1016_v15 = vpop.xlane.xlu1 %1015 }
 0x29b   : > { %v1078_v34 = vmul.f32 0.0078125, %v1016_v15  ;;  %v1153_v43 = vmul.f32 %v3780_v40, %v3780_v40 }
 0x29d   : > { %v3785_v39 = vsub.f32 %v3600_v17, %v1078_v34  ;;  %1203 = vadd.xlane.f32.xlu0 %v1153_v43 }
 0x29e   : > { %v1018_v9 = vpop.xlane.xlu0 %1017 }
 0x29f   : > { %v1079_v14 = vmul.f32 0.0078125, %v1018_v9  ;;  %v1154_v13 = vmul.f32 %v3785_v39, %v3785_v39 }
 0x2a1   : > { %v3790_v60 = vsub.f32 %v3605_v23, %v1079_v14  ;;  %1205 = vadd.xlane.f32.xlu1 %v1154_v13 }
 0x2a2   : > { %v1020_v19 = vpop.xlane.xlu1 %1019 }
 0x2a3   : > { %v1080_v45 = vmul.f32 0.0078125, %v1020_v19  ;;  %v1155_v42 = vmul.f32 %v3790_v60, %v3790_v60 }
 0x2a5   : > { %v3795_v54 = vsub.f32 %v3610_v59, %v1080_v45  ;;  %1207 = vadd.xlane.f32.xlu0 %v1155_v42 }
 0x2a6   : > { %v1022_v17 = vpop.xlane.xlu0 %1021 }
 0x2a7   : > { %v1081_v38 = vmul.f32 0.0078125, %v1022_v17  ;;  %v1156_v6 = vmul.f32 %v3795_v54, %v3795_v54 }
 0x2a9   : > { %v3800_v63 = vsub.f32 %v3615_v32, %v1081_v38  ;;  %1209 = vadd.xlane.f32.xlu1 %v1156_v6 }
 0x2aa   : > { %v1024_v23 = vpop.xlane.xlu1 %1023 }
 0x2ab   : > { %v1082_v12 = vmul.f32 0.0078125, %v1024_v23  ;;  %v1157_v27 = vmul.f32 %v3800_v63, %v3800_v63 }
 0x2ad   : > { %v3805_v3 = vsub.f32 %v3620_v26, %v1082_v12  ;;  %1211 = vadd.xlane.f32.xlu0 %v1157_v27 }
 0x2ae   : > { %v1026_v59 = vpop.xlane.xlu0 %1025 }
 0x2af   : > { %v1083_v4 = vmul.f32 0.0078125, %v1026_v59  ;;  %v1158_v49 = vmul.f32 %v3805_v3, %v3805_v3 }
 0x2b1   : > { %v3810_v55 = vsub.f32 %v3625_v35, %v1083_v4  ;;  %1213 = vadd.xlane.f32.xlu1 %v1158_v49 }
 0x2b2   : > { %v1028_v32 = vpop.xlane.xlu1 %1027 }
 0x2b3   : > { %v1084_v46 = vmul.f32 0.0078125, %v1028_v32  ;;  %v1159_v57 = vmul.f32 %v3810_v55, %v3810_v55 }
 0x2b5   : > { %v3815_v8 = vsub.f32 %v3630_v29, %v1084_v46  ;;  %1215 = vadd.xlane.f32.xlu0 %v1159_v57 }
 0x2b6   : > { %v1030_v26 = vpop.xlane.xlu0 %1029 }
 0x2b7   : > { %v1085_v20 = vmul.f32 0.0078125, %v1030_v26  ;;  %v1160_v5 = vmul.f32 %v3815_v8, %v3815_v8 }
 0x2b9   : > { %v3820_v15 = vsub.f32 %v3635_v1, %v1085_v20  ;;  %1217 = vadd.xlane.f32.xlu1 %v1160_v5 }
 0x2ba   : > { %v1032_v35 = vpop.xlane.xlu1 %1031 }
 0x2bb   : > { %v1086_v34 = vmul.f32 0.0078125, %v1032_v35  ;;  %v1161_v43 = vmul.f32 %v3820_v15, %v3820_v15 }
 0x2bd   : > { %v3825_v9 = vsub.f32 %v3640_v11, %v1086_v34  ;;  %1219 = vadd.xlane.f32.xlu0 %v1161_v43 }
 0x2be   : > { %v1034_v29 = vpop.xlane.xlu0 %1033 }
 0x2bf   : > { %v1087_v14 = vmul.f32 0.0078125, %v1034_v29  ;;  %v1162_v13 = vmul.f32 %v3825_v9, %v3825_v9 }
 0x2c1   : > { %v3830_v19 = vsub.f32 %v3645_v53, %v1087_v14  ;;  %1221 = vadd.xlane.f32.xlu1 %v1162_v13 }
 0x2c2   : > { %v1036_v1 = vpop.xlane.xlu1 %1035 }
 0x2c3   : > { %v1088_v45 = vmul.f32 0.0078125, %v1036_v1  ;;  %v1163_v42 = vmul.f32 %v3830_v19, %v3830_v19 }
 0x2c5   : > { %v3835_v17 = vsub.f32 %v3650_v44, %v1088_v45  ;;  %1223 = vadd.xlane.f32.xlu0 %v1163_v42 }
 0x2c6   : > { %v1038_v11 = vpop.xlane.xlu0 %1037 }
 0x2c7   : > { %v1089_v38 = vmul.f32 0.0078125, %v1038_v11  ;;  %v1164_v6 = vmul.f32 %v3835_v17, %v3835_v17 }
 0x2c9   : > { %v3840_v23 = vsub.f32 %v3655_v56, %v1089_v38  ;;  %1225 = vadd.xlane.f32.xlu1 %v1164_v6 }
 0x2ca   : > { %v1040_v53 = vpop.xlane.xlu1 %1039 }
 0x2cb   : > { %v1090_v12 = vmul.f32 0.0078125, %v1040_v53  ;;  %v1165_v27 = vmul.f32 %v3840_v23, %v3840_v23 }
 0x2cd   : > { %v3845_v59 = vsub.f32 %v3660_v61, %v1090_v12  ;;  %1227 = vadd.xlane.f32.xlu0 %v1165_v27 }
 0x2ce   : > { %v1042_v44 = vpop.xlane.xlu0 %1041 }
 0x2cf   : > { %v1091_v4 = vmul.f32 0.0078125, %v1042_v44  ;;  %v1166_v49 = vmul.f32 %v3845_v59, %v3845_v59 }
 0x2d1   : > { %v3850_v32 = vsub.f32 %v3665_v0, %v1091_v4  ;;  %1229 = vadd.xlane.f32.xlu1 %v1166_v49 }
 0x2d2   : > { %v1044_v56 = vpop.xlane.xlu1 %1043 }
 0x2d3   : > { %v1092_v46 = vmul.f32 0.0078125, %v1044_v56  ;;  %v1167_v57 = vmul.f32 %v3850_v32, %v3850_v32 }
 0x2d5   : > { %v3855_v26 = vsub.f32 %v3670_v28, %v1092_v46  ;;  %1231 = vadd.xlane.f32.xlu0 %v1167_v57 }
 0x2d6   : > { %v1046_v61 = vpop.xlane.xlu0 %1045 }
 0x2d7   : > { %v1093_v20 = vmul.f32 0.0078125, %v1046_v61  ;;  %v1168_v5 = vmul.f32 %v3855_v26, %v3855_v26 }
 0x2d9   : > { %v3860_v35 = vsub.f32 %v3675_v31, %v1093_v20  ;;  %1233 = vadd.xlane.f32.xlu1 %v1168_v5 }
 0x2da   : > { %v1048_v0 = vpop.xlane.xlu1 %1047 }
 0x2db   : > { %v1094_v34 = vmul.f32 0.0078125, %v1048_v0  ;;  %v1169_v43 = vmul.f32 %v3860_v35, %v3860_v35 }
 0x2dd   : > { %v3865_v29 = vsub.f32 %v3680_v47, %v1094_v34  ;;  %1235 = vadd.xlane.f32.xlu0 %v1169_v43 }
 0x2de   : > { %v1050_v28 = vpop.xlane.xlu0 %1049 }
 0x2df   : > { %v1095_v14 = vmul.f32 0.0078125, %v1050_v28  ;;  %v1170_v13 = vmul.f32 %v3865_v29, %v3865_v29 }
 0x2e1   : > { %v3870_v1 = vsub.f32 %v3685_v48, %v1095_v14  ;;  %1237 = vadd.xlane.f32.xlu1 %v1170_v13 }
 0x2e2   : > { %v1052_v31 = vpop.xlane.xlu1 %1051 }
 0x2e3   : > { %v1096_v45 = vmul.f32 0.0078125, %v1052_v31  ;;  %v1171_v42 = vmul.f32 %v3870_v1, %v3870_v1 }
 0x2e5   : > { %v3875_v11 = vsub.f32 %v3690_v18, %v1096_v45  ;;  %1239 = vadd.xlane.f32.xlu0 %v1171_v42 }
 0x2e6   : > { %v1054_v47 = vpop.xlane.xlu0 %1053 }
 0x2e7   : > { %v1097_v38 = vmul.f32 0.0078125, %v1054_v47  ;;  %v1172_v6 = vmul.f32 %v3875_v11, %v3875_v11 }
 0x2e9   : > { %v3880_v53 = vsub.f32 %v3695_v21, %v1097_v38  ;;  %1241 = vadd.xlane.f32.xlu1 %v1172_v6 }
 0x2ea   : > { %v1056_v48 = vpop.xlane.xlu1 %1055 }
 0x2eb   : > { %v1098_v12 = vmul.f32 0.0078125, %v1056_v48  ;;  %v1173_v27 = vmul.f32 %v3880_v53, %v3880_v53 }
 0x2ed   : > { %v3885_v44 = vsub.f32 %v3700_v41, %v1098_v12  ;;  %1243 = vadd.xlane.f32.xlu0 %v1173_v27 }
 0x2ee   : > { %v1058_v18 = vpop.xlane.xlu0 %1057 }
 0x2ef   : > { %v1099_v4 = vmul.f32 0.0078125, %v1058_v18  ;;  %v1174_v49 = vmul.f32 %v3885_v44, %v3885_v44 }
 0x2f1   : > { %v3890_v56 = vsub.f32 %v3704_v33, %v1099_v4  ;;  %1245 = vadd.xlane.f32.xlu1 %v1174_v49 }
 0x2f2   : > { %v1060_v21 = vpop.xlane.xlu1 %1059 }
 0x2f3   : > { %v1100_v46 = vmul.f32 0.0078125, %v1060_v21  ;;  %v1175_v57 = vmul.f32 %v3890_v56, %v3890_v56 }
 0x2f5   : > { %v3895_v61 = vsub.f32 %v3708_v7, %v1100_v46  ;;  %1247 = vadd.xlane.f32.xlu0 %v1175_v57 }
 0x2f6   : > { %v1062_v41 = vpop.xlane.xlu0 %1061 }
 0x2f7   : > { %v1101_v20 = vmul.f32 0.0078125, %v1062_v41  ;;  %v1176_v5 = vmul.f32 %v3895_v61, %v3895_v61 }
 0x2f9   : > { %v3900_v0 = vsub.f32 %v3715_v16, %v1101_v20  ;;  %1249 = vadd.xlane.f32.xlu1 %v1176_v5 }
 0x2fa   : > { %v1180_v33 = vpop.xlane.xlu0 %1179  ;;  %v1064_v34 = vpop.xlane.xlu1 %1063 }
 0x2fb   : > { %v1255_v43 = vmul.f32 0.007874016, %v1180_v33  ;;  %v1102_v28 = vmul.f32 0.0078125, %v1064_v34  ;;  %v1177_v14 = vmul.f32 %v3900_v0, %v3900_v0 }
 0x2fd   : > { %2720 = vrsqrt.f32 %v1255_v43  ;;  %1251 = vadd.xlane.f32.xlu0 %v1177_v14  ;;  %v3905_v7 = vsub.f32 %v3724_v22, %v1102_v28  ;;  %vm1295_vm1 = vcmp.eq.f32.partialorder %v1255_v43, inf  ;;  %v1298_v4 = vand.u32 2147483648, %v1255_v43 }
 0x2fe   : > { %v1184_v13 = vpop.xlane.xlu0 %1183  ;;  %v1182_v31 = vpop.xlane.xlu1 %1181  ;;  %vm1297_vm2 = vcmp.eq.f32.partialorder %v1255_v43, 0.0 }
 0x2ff   : > { %v1257_v45 = vmul.f32 0.007874016, %v1184_v13  ;;  %v1256_v42 = vmul.f32 0.007874016, %v1182_v31  ;;  %v1178_v16 = vmul.f32 %v3905_v7, %v3905_v7 }
 0x301   : > { %2722 = vrsqrt.f32 %v1257_v45  ;;  %1253 = vadd.xlane.f32.xlu1 %v1178_v16  ;;  %vm1309_vm3 = vcmp.eq.f32.partialorder %v1257_v45, inf  ;;  %vm1311_vm4 = vcmp.eq.f32.partialorder %v1257_v45, 0.0  ;;  %v1312_v34 = vand.u32 2147483648, %v1257_v45 }
 0x302   : > { %2724 = vrsqrt.f32 %v1256_v42  ;;  %v1186_v47 = vpop.xlane.xlu1 %1185  ;;  %vm1302_vm5 = vcmp.eq.f32.partialorder %v1256_v42, inf  ;;  %v1305_v13 = vand.u32 2147483648, %v1256_v42  ;;  %vm1304_vm6 = vcmp.eq.f32.partialorder %v1256_v42, 0.0 }
 0x303   : > { %v1258_v38 = vmul.f32 0.007874016, %v1186_v47 }
 0x305   : > { %2726 = vrsqrt.f32 %v1258_v38  ;;  %vm1316_vm7 = vcmp.eq.f32.partialorder %v1258_v38, inf  ;;  %vm1318_vm8 = vcmp.eq.f32.partialorder %v1258_v38, 0.0 }
 0x306   : > { %v1188_v6 = vpop.xlane.xlu0 %1187 }
 0x307   : > { %v1259_v48 = vmul.f32 0.007874016, %v1188_v6 }
 0x309   : > { %2728 = vrsqrt.f32 %v1259_v48  ;;  %vm1323_vm9 = vcmp.eq.f32.partialorder %v1259_v48, inf  ;;  %vm1325_vm10 = vcmp.eq.f32.partialorder %v1259_v48, 0.0 }
 0x30a   : > { %v2721_v12 = vpop.eup %2720  ;;  %v1190_v27 = vpop.xlane.xlu1 %1189 }
 0x30b   : > { %v1294_v22 = vmul.f32 %v2721_v12, %v1255_v43  ;;  %v3909_v18 = vmul.f32 0.007874016, %v1190_v27 }
 0x30d   : > { %v1296_v49 = vsel %vm1295_vm1, %v1255_v43, %v1294_v22  ;;  %2730 = vrsqrt.f32 %v3909_v18  ;;  %vm1330_vm11 = vcmp.eq.f32.partialorder %v3909_v18, inf  ;;  %vm1332_vm12 = vcmp.eq.f32.partialorder %v3909_v18, 0.0 }
 0x30e   : > { %v2723_v21 = vpop.eup %2722  ;;  %v1299_v46 = vsel %vm1297_vm2, %v1298_v4, %v1296_v49  ;;  %v1192_v57 = vpop.xlane.xlu0 %1191  ;;  %v1319_v49 = vand.u32 2147483648, %v1258_v38 }
 0x30f   : > { %v2725_v41 = vpop.eup %2724  ;;  %v1559_v20 = vadd.f32 -60.0, %v1299_v46  ;;  %v1308_v5 = vmul.f32 %v2723_v21, %v1257_v45  ;;  %v3912_v33 = vmul.f32 0.007874016, %v1192_v57 }
 0x310   : > { %v1301_v28 = vmul.f32 %v2725_v41, %v1256_v42 }
 0x311   : > { %2732 = vrcp.f32 %v1559_v20  ;;  %v1310_v14 = vsel %vm1309_vm3, %v1257_v45, %v1308_v5  ;;  %v1326_v5 = vand.u32 2147483648, %v1259_v48  ;;  %vm1337_vm13 = vcmp.eq.f32.partialorder %v3912_v33, inf }
 0x312   : > { %v2727_v31 = vpop.eup %2726  ;;  %v1313_v43 = vsel %vm1311_vm4, %v1312_v34, %v1310_v14  ;;  %v1303_v16 = vsel %vm1302_vm5, %v1256_v42, %v1301_v28  ;;  %2734 = vrsqrt.f32 %v3912_v33  ;;  %v1194_v47 = vpop.xlane.xlu1 %1193  ;;  %vm1339_vm14 = vcmp.eq.f32.partialorder %v3912_v33, 0.0 }
 0x313   : > { %v1561_v6 = vadd.f32 -60.0, %v1313_v43  ;;  %v1306_v12 = vsel %vm1304_vm6, %v1305_v13, %v1303_v16  ;;  %v1315_v27 = vmul.f32 %v2727_v31, %v1258_v38  ;;  %v3915_v22 = vmul.f32 0.007874016, %v1194_v47 }
 0x314   : > { %v1560_v4 = vadd.f32 -60.0, %v1306_v12 }
 0x315   : > { %2736 = vrcp.f32 %v1561_v6  ;;  %v1317_v45 = vsel %vm1316_vm7, %v1258_v38, %v1315_v27  ;;  %v3924_v38 = vld [vmem:[%s4482_s3] ss:$0 sm:$0xff]  ;;  %vm1344_vm15 = vcmp.eq.f32.partialorder %v3915_v22, inf  ;;  %vm1346_vm0 = vcmp.eq.f32.partialorder %v3915_v22, 0.0 }
 0x316   : > { %v2729_v21 = vpop.eup %2728  ;;  %2738 = vrcp.f32 %v1560_v4  ;;  %v1320_v46 = vsel %vm1318_vm8, %v1319_v49, %v1317_v45  ;;  %v1196_v57 = vpop.xlane.xlu0 %1195  ;;  %v1642_v47 = vmul.f32 %v3924_v38, %v3712_v25  ;;  %v3939_v27 = vld [vmem:[%s4483_s4] ss:$0 sm:$0xff]  ;;  %v1644_v25 = vmul.f32 %v3924_v38, %v3727_v62 }
 0x317   : > { %v1562_v42 = vadd.f32 -60.0, %v1320_v46  ;;  %v1322_v41 = vmul.f32 %v2729_v21, %v1259_v48  ;;  %2740 = vrsqrt.f32 %v3915_v22  ;;  %v3918_v20 = vmul.f32 0.007874016, %v1196_v57 }
 0x319   : > { %2742 = vrcp.f32 %v1562_v42  ;;  %v1324_v34 = vsel %vm1323_vm9, %v1259_v48, %v1322_v41  ;;  %v1333_v48 = vand.u32 2147483648, %v3909_v18  ;;  %v1340_v41 = vand.u32 2147483648, %v3912_v33 }
 0x31a   : > { %v2731_v28 = vpop.eup %2730  ;;  %v1327_v14 = vsel %vm1325_vm10, %v1326_v5, %v1324_v34  ;;  %2744 = vrsqrt.f32 %v3918_v20  ;;  %v1198_v13 = vpop.xlane.xlu1 %1197  ;;  %v1643_v34 = vmul.f32 %v3924_v38, %v3719_v36  ;;  %vm1351_vm1 = vcmp.eq.f32.partialorder %v3918_v20, inf }
 0x31b   : > { %v1563_v31 = vadd.f32 -60.0, %v1327_v14  ;;  %v1329_v43 = vmul.f32 %v2731_v28, %v3909_v18  ;;  %v3928_v16 = vmul.f32 0.007874016, %v1198_v13  ;;  %vm1353_vm2 = vcmp.eq.f32.partialorder %v3918_v20, 0.0 }
 0x31d   : > { %2746 = vrcp.f32 %v1563_v31  ;;  %v1331_v6 = vsel %vm1330_vm11, %v3909_v18, %v1329_v43  ;;  %vm1358_vm3 = vcmp.eq.f32.partialorder %v3928_v16, inf  ;;  %vm1360_vm4 = vcmp.eq.f32.partialorder %v3928_v16, 0.0 }
 0x31e   : > { %v2733_v12 = vpop.eup %2732  ;;  %v1334_v4 = vsel %vm1332_vm12, %v1333_v48, %v1331_v6  ;;  %2748 = vrsqrt.f32 %v3928_v16  ;;  %v1200_v49 = vpop.xlane.xlu0 %1199  ;;  %v1645_v6 = vmul.f32 %v3924_v38, %v3735_v10 }
 0x31f   : > { %v2735_v45 = vpop.eup %2734  ;;  %v1680_v21 = vmul.f32 %v2733_v12, %v1642_v47  ;;  %v1564_v46 = vadd.f32 -60.0, %v1334_v4  ;;  %v3942_v57 = vmul.f32 0.007874016, %v1200_v49 }
 0x320   : > { %v1336_v18 = vmul.f32 %v2735_v45, %v3912_v33  ;;  %v1347_v45 = vand.u32 2147483648, %v3915_v22 }
 0x321   : > { %v1725_v42 = vadd.f32 %v3939_v27, %v1680_v21  ;;  %2750 = vrcp.f32 %v1564_v46  ;;  %vm1365_vm5 = vcmp.eq.f32.partialorder %v3942_v57, inf  ;;  %vm1367_vm6 = vcmp.eq.f32.partialorder %v3942_v57, 0.0 }
 0x322   : > { %v2737_v5 = vpop.eup %2736  ;;  %v1338_v28 = vsel %vm1337_vm13, %v3912_v33, %v1336_v18  ;;  %2752 = vrsqrt.f32 %v3942_v57  ;;  %v1202_v62 = vpop.xlane.xlu1 %1201 }
 0x323   : > { %v2739_v14 = vpop.eup %2738  ;;  %1763 = vst [vmem:[%s3955_s13] sm:$0xff] %v1725_v42  ;;  %v1682_v13 = vmul.f32 %v2737_v5, %v1644_v25  ;;  %v1341_v31 = vsel %vm1339_vm14, %v1340_v41, %v1338_v28  ;;  %v3958_v43 = vmul.f32 0.007874016, %v1202_v62  ;;  %v1646_v42 = vmul.f32 %v3924_v38, %v3740_v30 }
 0x324   : > { %v2741_v48 = vpop.eup %2740  ;;  %v1681_v47 = vmul.f32 %v2739_v14, %v1643_v34  ;;  %v1565_v36 = vadd.f32 -60.0, %v1341_v31  ;;  %v1354_v62 = vand.u32 2147483648, %v3918_v20 }
 0x325   : > { %v1727_v33 = vadd.f32 %v3939_v27, %v1682_v13  ;;  %v1343_v12 = vmul.f32 %v2741_v48, %v3915_v22  ;;  %2754 = vrsqrt.f32 %v3958_v43  ;;  %vm1372_vm7 = vcmp.eq.f32.partialorder %v3958_v43, inf }
 0x326   : > { %v2743_v4 = vpop.eup %2742  ;;  %v1726_v49 = vadd.f32 %v3939_v27, %v1681_v47  ;;  %2756 = vrcp.f32 %v1565_v36  ;;  %v1204_v21 = vpop.xlane.xlu0 %1203  ;;  %v1647_v36 = vmul.f32 %v3924_v38, %v3745_v52  ;;  %vm1374_vm8 = vcmp.eq.f32.partialorder %v3958_v43, 0.0 }
 0x327   : > { %v2745_v46 = vpop.eup %2744  ;;  %1765 = vst [vmem:[%s3955_s13 + $0x10] sm:$0xff] %v1727_v33  ;;  %v1683_v25 = vmul.f32 %v2743_v4, %v1645_v6  ;;  %v1345_v10 = vsel %vm1344_vm15, %v3915_v22, %v1343_v12  ;;  %v3971_v18 = vmul.f32 0.007874016, %v1204_v21 }
 0x328   : > { %1764 = vst [vmem:[%s3955_s13 + $0x8] sm:$0xff] %v1726_v49  ;;  %v1348_v41 = vsel %vm1346_vm0, %v1347_v45, %v1345_v10  ;;  %v1350_v5 = vmul.f32 %v2745_v46, %v3918_v20 }
 0x329   : > { %v1728_v34 = vadd.f32 %v3939_v27, %v1683_v25  ;;  %v1566_v28 = vadd.f32 -60.0, %v1348_v41  ;;  %2758 = vrsqrt.f32 %v3971_v18  ;;  %vm1379_vm9 = vcmp.eq.f32.partialorder %v3971_v18, inf }
 0x32a   : > { %v2747_v22 = vpop.eup %2746  ;;  %v1352_v14 = vsel %vm1351_vm1, %v3918_v20, %v1350_v5  ;;  %v1206_v13 = vpop.xlane.xlu1 %1205  ;;  %v1361_v20 = vand.u32 2147483648, %v3928_v16  ;;  %v1368_v5 = vand.u32 2147483648, %v3942_v57  ;;  %vm1381_vm10 = vcmp.eq.f32.partialorder %v3971_v18, 0.0 }
 0x32b   : > { %v2749_v30 = vpop.eup %2748  ;;  %1766 = vst [vmem:[%s3955_s13 + $0x18] sm:$0xff] %v1728_v34  ;;  %v1684_v31 = vmul.f32 %v2747_v22, %v1646_v42  ;;  %2760 = vrcp.f32 %v1566_v28  ;;  %v1355_v48 = vsel %vm1353_vm2, %v1354_v62, %v1352_v14  ;;  %v3984_v47 = vmul.f32 0.007874016, %v1206_v13 }
 0x32c   : > { %v1567_v6 = vadd.f32 -60.0, %v1355_v48  ;;  %v1357_v33 = vmul.f32 %v2749_v30, %v3928_v16  ;;  %v1648_v34 = vmul.f32 %v3924_v38, %v3750_v24  ;;  %v1375_v24 = vand.u32 2147483648, %v3958_v43 }
 0x32d   : > { %v1729_v12 = vadd.f32 %v3939_v27, %v1684_v31  ;;  %2762 = vrsqrt.f32 %v3984_v47  ;;  %vm1386_vm11 = vcmp.eq.f32.partialorder %v3984_v47, inf  ;;  %vm1388_vm12 = vcmp.eq.f32.partialorder %v3984_v47, 0.0 }
 0x32e   : > { %v2751_v4 = vpop.eup %2750  ;;  %2764 = vrcp.f32 %v1567_v6  ;;  %v1359_v49 = vsel %vm1358_vm3, %v3928_v16, %v1357_v33  ;;  %v1208_v45 = vpop.xlane.xlu0 %1207 }
 0x32f   : > { %v2753_v21 = vpop.eup %2752  ;;  %1767 = vst [vmem:[%s3955_s13 + $0x20] sm:$0xff] %v1729_v12  ;;  %v1685_v52 = vmul.f32 %v2751_v4, %v1647_v36  ;;  %v1362_v46 = vsel %vm1360_vm4, %v1361_v20, %v1359_v49  ;;  %v3996_v25 = vmul.f32 0.007874016, %v1208_v45  ;;  %v1649_v20 = vmul.f32 %v3924_v38, %v3755_v51 }
 0x330   : > { %v1568_v10 = vadd.f32 -60.0, %v1362_v46  ;;  %v1364_v42 = vmul.f32 %v2753_v21, %v3942_v57  ;;  %v1650_v51 = vmul.f32 %v3924_v38, %v3760_v58 }
 0x331   : > { %v1730_v41 = vadd.f32 %v3939_v27, %v1685_v52  ;;  %2766 = vrsqrt.f32 %v3996_v25  ;;  %vm1393_vm13 = vcmp.eq.f32.partialorder %v3996_v25, inf  ;;  %vm1395_vm14 = vcmp.eq.f32.partialorder %v3996_v25, 0.0 }
 0x332   : > { %v2755_v16 = vpop.eup %2754  ;;  %2768 = vrcp.f32 %v1568_v10  ;;  %v1366_v28 = vsel %vm1365_vm5, %v3942_v57, %v1364_v42  ;;  %v1210_v62 = vpop.xlane.xlu1 %1209 }
 0x333   : > { %v2757_v22 = vpop.eup %2756  ;;  %1768 = vst [vmem:[%s3955_s13 + $0x28] sm:$0xff] %v1730_v41  ;;  %v1369_v14 = vsel %vm1367_vm6, %v1368_v5, %v1366_v28  ;;  %v1371_v13 = vmul.f32 %v2755_v16, %v3958_v43  ;;  %v4009_v30 = vmul.f32 0.007874016, %v1210_v62 }
 0x334   : > { %v1686_v31 = vmul.f32 %v2757_v22, %v1648_v34  ;;  %v1569_v48 = vadd.f32 -60.0, %v1369_v14 }
 0x335   : > { %v1373_v36 = vsel %vm1372_vm7, %v3958_v43, %v1371_v13  ;;  %2770 = vrsqrt.f32 %v4009_v30  ;;  %v1382_v43 = vand.u32 2147483648, %v3971_v18  ;;  %v1651_v13 = vmul.f32 %v3924_v38, %v3765_v2 }
 0x336   : > { %v2759_v57 = vpop.eup %2758  ;;  %v1731_v6 = vadd.f32 %v3939_v27, %v1686_v31  ;;  %2772 = vrcp.f32 %v1569_v48  ;;  %v1376_v33 = vsel %vm1374_vm8, %v1375_v24, %v1373_v36  ;;  %v1212_v12 = vpop.xlane.xlu0 %1211  ;;  %vm1400_vm15 = vcmp.eq.f32.partialorder %v4009_v30, inf }
 0x337   : > { %v1570_v4 = vadd.f32 -60.0, %v1376_v33  ;;  %v1378_v49 = vmul.f32 %v2759_v57, %v3971_v18  ;;  %v4020_v45 = vmul.f32 0.007874016, %v1212_v12  ;;  %vm1402_vm0 = vcmp.eq.f32.partialorder %v4009_v30, 0.0 }
 0x338   : > { %v2761_v21 = vpop.eup %2760  ;;  %1769 = vst [vmem:[%s3955_s13 + $0x30] sm:$0xff] %v1731_v6 }
 0x339   : > { %v1687_v52 = vmul.f32 %v2761_v21, %v1649_v20  ;;  %2774 = vrcp.f32 %v1570_v4  ;;  %v1380_v46 = vsel %vm1379_vm9, %v3971_v18, %v1378_v49  ;;  %v1389_v18 = vand.u32 2147483648, %v3984_v47 }
 0x33a   : > { %v2763_v10 = vpop.eup %2762  ;;  %v1383_v42 = vsel %vm1381_vm10, %v1382_v43, %v1380_v46  ;;  %2776 = vrsqrt.f32 %v4020_v45  ;;  %v1214_v41 = vpop.xlane.xlu1 %1213  ;;  %v1652_v4 = vmul.f32 %v3924_v38, %v3770_v37  ;;  %v1653_v37 = vmul.f32 %v3924_v38, %v3775_v50 }
 0x33b   : > { %v2765_v5 = vpop.eup %2764  ;;  %v1732_v16 = vadd.f32 %v3939_v27, %v1687_v52  ;;  %v1571_v34 = vadd.f32 -60.0, %v1383_v42  ;;  %v1385_v28 = vmul.f32 %v2763_v10, %v3984_v47  ;;  %v4032_v62 = vmul.f32 0.007874016, %v1214_v41 }
 0x33c   : > { %v1688_v22 = vmul.f32 %v2765_v5, %v1650_v51  ;;  %v1654_v50 = vmul.f32 %v3924_v38, %v3780_v40  ;;  %vm1407_vm1 = vcmp.eq.f32.partialorder %v4020_v45, inf  ;;  %vm1409_vm2 = vcmp.eq.f32.partialorder %v4020_v45, 0.0 }
 0x33d   : > { %1770 = vst [vmem:[%s3955_s13 + $0x38] sm:$0xff] %v1732_v16  ;;  %2778 = vrcp.f32 %v1571_v34  ;;  %v1387_v58 = vsel %vm1386_vm11, %v3984_v47, %v1385_v28  ;;  %v1396_v47 = vand.u32 2147483648, %v3996_v25  ;;  %vm1414_vm3 = vcmp.eq.f32.partialorder %v4032_v62, inf }
 0x33e   : > { %v2767_v14 = vpop.eup %2766  ;;  %v1733_v31 = vadd.f32 %v3939_v27, %v1688_v22  ;;  %v1390_v48 = vsel %vm1388_vm12, %v1389_v18, %v1387_v58  ;;  %2780 = vrsqrt.f32 %v4032_v62  ;;  %v1216_v24 = vpop.xlane.xlu0 %1215  ;;  %vm1416_vm4 = vcmp.eq.f32.partialorder %v4032_v62, 0.0 }
 0x33f   : > { %v2769_v36 = vpop.eup %2768  ;;  %v1572_v57 = vadd.f32 -60.0, %v1390_v48  ;;  %v1392_v6 = vmul.f32 %v2767_v14, %v3996_v25  ;;  %v4044_v33 = vmul.f32 0.007874016, %v1216_v24 }
 0x340   : > { %1771 = vst [vmem:[%s3955_s13 + $0x40] sm:$0xff] %v1733_v31  ;;  %v1689_v12 = vmul.f32 %v2769_v36, %v1651_v13  ;;  %v1410_v31 = vand.u32 2147483648, %v4020_v45 }
 0x341   : > { %2782 = vrcp.f32 %v1572_v57  ;;  %v1394_v2 = vsel %vm1393_vm13, %v3996_v25, %v1392_v6  ;;  %v1403_v25 = vand.u32 2147483648, %v4009_v30  ;;  %vm1421_vm5 = vcmp.eq.f32.partialorder %v4044_v33, inf }
 0x342   : > { %v2771_v20 = vpop.eup %2770  ;;  %v1734_v49 = vadd.f32 %v3939_v27, %v1689_v12  ;;  %v1397_v21 = vsel %vm1395_vm14, %v1396_v47, %v1394_v2  ;;  %2784 = vrsqrt.f32 %v4044_v33  ;;  %v1218_v43 = vpop.xlane.xlu1 %1217  ;;  %v1655_v47 = vmul.f32 %v3924_v38, %v3785_v39 }
 0x343   : > { %v2773_v52 = vpop.eup %2772  ;;  %v1573_v46 = vadd.f32 -60.0, %v1397_v21  ;;  %v1399_v10 = vmul.f32 %v2771_v20, %v4009_v30  ;;  %v4056_v51 = vmul.f32 0.007874016, %v1218_v43  ;;  %vm1423_vm6 = vcmp.eq.f32.partialorder %v4044_v33, 0.0 }
 0x344   : > { %1772 = vst [vmem:[%s3955_s13 + $0x48] sm:$0xff] %v1734_v49  ;;  %v1690_v42 = vmul.f32 %v2773_v52, %v1652_v4 }
 0x345   : > { %2786 = vrcp.f32 %v1573_v46  ;;  %v1401_v41 = vsel %vm1400_vm15, %v4009_v30, %v1399_v10  ;;  %vm1428_vm7 = vcmp.eq.f32.partialorder %v4056_v51, inf  ;;  %vm1430_vm8 = vcmp.eq.f32.partialorder %v4056_v51, 0.0 }
 0x346   : > { %v2775_v5 = vpop.eup %2774  ;;  %v1735_v16 = vadd.f32 %v3939_v27, %v1690_v42  ;;  %v1404_v34 = vsel %vm1402_vm0, %v1403_v25, %v1401_v41  ;;  %2788 = vrsqrt.f32 %v4056_v51  ;;  %v1220_v28 = vpop.xlane.xlu0 %1219  ;;  %v1656_v42 = vmul.f32 %v3924_v38, %v3790_v60 }
 0x347   : > { %v2777_v22 = vpop.eup %2776  ;;  %v1691_v18 = vmul.f32 %v2775_v5, %v1653_v37  ;;  %v1574_v58 = vadd.f32 -60.0, %v1404_v34  ;;  %v4067_v14 = vmul.f32 0.007874016, %v1220_v28 }
 0x348   : > { %1773 = vst [vmem:[%s3955_s13 + $0x50] sm:$0xff] %v1735_v16  ;;  %v1406_v13 = vmul.f32 %v2777_v22, %v4020_v45 }
 0x349   : > { %v1736_v30 = vadd.f32 %v3939_v27, %v1691_v18  ;;  %2790 = vrcp.f32 %v1574_v58  ;;  %v1657_v58 = vmul.f32 %v3924_v38, %v3795_v54  ;;  %vm1435_vm9 = vcmp.eq.f32.partialorder %v4067_v14, inf }
 0x34a   : > { %v2779_v48 = vpop.eup %2778  ;;  %v1408_v24 = vsel %vm1407_vm1, %v4020_v45, %v1406_v13  ;;  %2792 = vrsqrt.f32 %v4067_v14  ;;  %v1222_v36 = vpop.xlane.xlu1 %1221  ;;  %v1417_v45 = vand.u32 2147483648, %v4032_v62  ;;  %vm1437_vm10 = vcmp.eq.f32.partialorder %v4067_v14, 0.0 }
 0x34b   : > { %v2781_v57 = vpop.eup %2780  ;;  %1774 = vst [vmem:[%s3955_s13 + $0x58] sm:$0xff] %v1736_v30  ;;  %v1692_v40 = vmul.f32 %v2779_v48, %v1654_v50  ;;  %v1411_v6 = vsel %vm1409_vm2, %v1410_v31, %v1408_v24  ;;  %v4080_v12 = vmul.f32 0.007874016, %v1222_v36 }
 0x34c   : > { %v1575_v2 = vadd.f32 -60.0, %v1411_v6  ;;  %v1413_v20 = vmul.f32 %v2781_v57, %v4032_v62 }
 0x34d   : > { %v1737_v4 = vadd.f32 %v3939_v27, %v1692_v40  ;;  %2794 = vrsqrt.f32 %v4080_v12  ;;  %vm1442_vm11 = vcmp.eq.f32.partialorder %v4080_v12, inf  ;;  %vm1444_vm12 = vcmp.eq.f32.partialorder %v4080_v12, 0.0 }
 0x34e   : > { %v2783_v49 = vpop.eup %2782  ;;  %2796 = vrcp.f32 %v1575_v2  ;;  %v1415_v21 = vsel %vm1414_vm3, %v4032_v62, %v1413_v20  ;;  %v1224_v43 = vpop.xlane.xlu0 %1223  ;;  %v1424_v62 = vand.u32 2147483648, %v4044_v33  ;;  %v1438_v20 = vand.u32 2147483648, %v4067_v14 }
 0x34f   : > { %v2785_v52 = vpop.eup %2784  ;;  %1775 = vst [vmem:[%s3955_s13 + $0x60] sm:$0xff] %v1737_v4  ;;  %v1693_v39 = vmul.f32 %v2783_v49, %v1655_v47  ;;  %v1418_v46 = vsel %vm1416_vm4, %v1417_v45, %v1415_v21  ;;  %v4092_v10 = vmul.f32 0.007874016, %v1224_v43  ;;  %v1658_v4 = vmul.f32 %v3924_v38, %v3800_v63 }
 0x350   : > { %v1576_v25 = vadd.f32 -60.0, %v1418_v46  ;;  %v1420_v37 = vmul.f32 %v2785_v52, %v4044_v33  ;;  %v1445_v63 = vand.u32 2147483648, %v4080_v12 }
 0x351   : > { %v1738_v41 = vadd.f32 %v3939_v27, %v1693_v39  ;;  %2798 = vrsqrt.f32 %v4092_v10  ;;  %vm1449_vm13 = vcmp.eq.f32.partialorder %v4092_v10, inf  ;;  %vm1451_vm14 = vcmp.eq.f32.partialorder %v4092_v10, 0.0 }
 0x352   : > { %v2787_v5 = vpop.eup %2786  ;;  %2800 = vrcp.f32 %v1576_v25  ;;  %v1422_v16 = vsel %vm1421_vm5, %v4044_v33, %v1420_v37  ;;  %v1226_v34 = vpop.xlane.xlu1 %1225  ;;  %v1431_v33 = vand.u32 2147483648, %v4056_v51  ;;  %v1659_v37 = vmul.f32 %v3924_v38, %v3805_v3 }
 0x353   : > { %v2789_v28 = vpop.eup %2788  ;;  %1776 = vst [vmem:[%s3955_s13 + $0x68] sm:$0xff] %v1738_v41  ;;  %v1694_v60 = vmul.f32 %v2787_v5, %v1656_v42  ;;  %v1425_v22 = vsel %vm1423_vm6, %v1424_v62, %v1422_v16  ;;  %v4104_v18 = vmul.f32 0.007874016, %v1226_v34 }
 0x354   : > { %v1577_v50 = vadd.f32 -60.0, %v1425_v22  ;;  %v1427_v13 = vmul.f32 %v2789_v28, %v4056_v51 }
 0x355   : > { %v1739_v30 = vadd.f32 %v3939_v27, %v1694_v60  ;;  %2802 = vrsqrt.f32 %v4104_v18  ;;  %vm1456_vm15 = vcmp.eq.f32.partialorder %v4104_v18, inf  ;;  %vm1458_vm0 = vcmp.eq.f32.partialorder %v4104_v18, 0.0 }
 0x356   : > { %v2791_v31 = vpop.eup %2790  ;;  %2804 = vrcp.f32 %v1577_v50  ;;  %v1429_v48 = vsel %vm1428_vm7, %v4056_v51, %v1427_v13  ;;  %v1228_v24 = vpop.xlane.xlu0 %1227  ;;  %v1660_v50 = vmul.f32 %v3924_v38, %v3810_v55 }
 0x357   : > { %v2793_v36 = vpop.eup %2792  ;;  %1777 = vst [vmem:[%s3955_s13 + $0x70] sm:$0xff] %v1739_v30  ;;  %v1695_v54 = vmul.f32 %v2791_v31, %v1657_v58  ;;  %v1432_v57 = vsel %vm1430_vm8, %v1431_v33, %v1429_v48  ;;  %v4116_v40 = vmul.f32 0.007874016, %v1228_v24 }
 0x358   : > { %v1578_v6 = vadd.f32 -60.0, %v1432_v57  ;;  %v1434_v47 = vmul.f32 %v2793_v36, %v4067_v14 }
 0x359   : > { %v1740_v2 = vadd.f32 %v3939_v27, %v1695_v54  ;;  %2806 = vrsqrt.f32 %v4116_v40  ;;  %vm1463_vm1 = vcmp.eq.f32.partialorder %v4116_v40, inf  ;;  %vm1465_vm2 = vcmp.eq.f32.partialorder %v4116_v40, 0.0 }
 0x35a   : > { %v2795_v51 = vpop.eup %2794  ;;  %2808 = vrcp.f32 %v1578_v6  ;;  %v1436_v45 = vsel %vm1435_vm9, %v4067_v14, %v1434_v47  ;;  %v1230_v49 = vpop.xlane.xlu1 %1229  ;;  %v1661_v6 = vmul.f32 %v3924_v38, %v3815_v8 }
 0x35b   : > { %v2797_v21 = vpop.eup %2796  ;;  %1778 = vst [vmem:[%s3955_s13 + $0x78] sm:$0xff] %v1740_v2  ;;  %v1439_v43 = vsel %vm1437_vm10, %v1438_v20, %v1436_v45  ;;  %v1441_v52 = vmul.f32 %v2795_v51, %v4080_v12  ;;  %v4129_v39 = vmul.f32 0.007874016, %v1230_v49 }
 0x35c   : > { %v1696_v46 = vmul.f32 %v2797_v21, %v1658_v4  ;;  %v1579_v42 = vadd.f32 -60.0, %v1439_v43 }
 0x35d   : > { %v1443_v25 = vsel %vm1442_vm11, %v4080_v12, %v1441_v52  ;;  %2810 = vrsqrt.f32 %v4129_v39  ;;  %v1452_v12 = vand.u32 2147483648, %v4092_v10  ;;  %v1662_v52 = vmul.f32 %v3924_v38, %v3820_v15 }
 0x35e   : > { %v2799_v14 = vpop.eup %2798  ;;  %v1741_v41 = vadd.f32 %v3939_v27, %v1696_v46  ;;  %2812 = vrcp.f32 %v1579_v42  ;;  %v1446_v62 = vsel %vm1444_vm12, %v1445_v63, %v1443_v25  ;;  %v1232_v5 = vpop.xlane.xlu0 %1231  ;;  %vm1470_vm3 = vcmp.eq.f32.partialorder %v4129_v39, inf }
 0x35f   : > { %v2801_v16 = vpop.eup %2800  ;;  %v1580_v34 = vadd.f32 -60.0, %v1446_v62  ;;  %v1448_v28 = vmul.f32 %v2799_v14, %v4092_v10  ;;  %v4140_v60 = vmul.f32 0.007874016, %v1232_v5  ;;  %v1663_v15 = vmul.f32 %v3924_v38, %v3825_v9 }
 0x360   : > { %1779 = vst [vmem:[%s3955_s13 + $0x80] sm:$0xff] %v1741_v41  ;;  %v1697_v22 = vmul.f32 %v2801_v16, %v1659_v37  ;;  %vm1472_vm4 = vcmp.eq.f32.partialorder %v4129_v39, 0.0  ;;  %v1664_v9 = vmul.f32 %v3924_v38, %v3830_v19 }
 0x361   : > { %2814 = vrcp.f32 %v1580_v34  ;;  %v1450_v3 = vsel %vm1449_vm13, %v4092_v10, %v1448_v28  ;;  %v1459_v10 = vand.u32 2147483648, %v4104_v18  ;;  %vm1477_vm5 = vcmp.eq.f32.partialorder %v4140_v60, inf }
 0x362   : > { %v2803_v58 = vpop.eup %2802  ;;  %v1742_v13 = vadd.f32 %v3939_v27, %v1697_v22  ;;  %v1453_v30 = vsel %vm1451_vm14, %v1452_v12, %v1450_v3  ;;  %2816 = vrsqrt.f32 %v4140_v60  ;;  %v1234_v33 = vpop.xlane.xlu1 %1233  ;;  %vm1479_vm6 = vcmp.eq.f32.partialorder %v4140_v60, 0.0 }
 0x363   : > { %v2805_v31 = vpop.eup %2804  ;;  %v1581_v48 = vadd.f32 -60.0, %v1453_v30  ;;  %v1455_v24 = vmul.f32 %v2803_v58, %v4104_v18  ;;  %v4152_v36 = vmul.f32 0.007874016, %v1234_v33  ;;  %v1480_v30 = vand.u32 2147483648, %v4140_v60 }
 0x364   : > { %1780 = vst [vmem:[%s3955_s13 + $0x88] sm:$0xff] %v1742_v13  ;;  %v1698_v54 = vmul.f32 %v2805_v31, %v1660_v50 }
 0x365   : > { %2818 = vrcp.f32 %v1581_v48  ;;  %v1457_v55 = vsel %vm1456_vm15, %v4104_v18, %v1455_v24  ;;  %v1466_v18 = vand.u32 2147483648, %v4116_v40  ;;  %vm1484_vm7 = vcmp.eq.f32.partialorder %v4152_v36, inf }
 0x366   : > { %v2807_v57 = vpop.eup %2806  ;;  %v1743_v47 = vadd.f32 %v3939_v27, %v1698_v54  ;;  %v1460_v2 = vsel %vm1458_vm0, %v1459_v10, %v1457_v55  ;;  %2820 = vrsqrt.f32 %v4152_v36  ;;  %v1236_v20 = vpop.xlane.xlu0 %1235  ;;  %v1665_v55 = vmul.f32 %v3924_v38, %v3835_v17 }
 0x367   : > { %v2809_v51 = vpop.eup %2808  ;;  %v1582_v4 = vadd.f32 -60.0, %v1460_v2  ;;  %v1462_v45 = vmul.f32 %v2807_v57, %v4116_v40  ;;  %v4164_v49 = vmul.f32 0.007874016, %v1236_v20  ;;  %vm1486_vm8 = vcmp.eq.f32.partialorder %v4152_v36, 0.0 }
 0x368   : > { %1781 = vst [vmem:[%s3955_s13 + $0x90] sm:$0xff] %v1743_v47  ;;  %v1699_v21 = vmul.f32 %v2809_v51, %v1661_v6 }
 0x369   : > { %2822 = vrcp.f32 %v1582_v4  ;;  %v1464_v8 = vsel %vm1463_vm1, %v4116_v40, %v1462_v45  ;;  %v1473_v40 = vand.u32 2147483648, %v4129_v39  ;;  %vm1491_vm9 = vcmp.eq.f32.partialorder %v4164_v49, inf }
 0x36a   : > { %v2811_v43 = vpop.eup %2810  ;;  %v1744_v46 = vadd.f32 %v3939_v27, %v1699_v21  ;;  %v1467_v42 = vsel %vm1465_vm2, %v1466_v18, %v1464_v8  ;;  %2824 = vrsqrt.f32 %v4164_v49  ;;  %v1238_v63 = vpop.xlane.xlu1 %1237  ;;  %v1666_v18 = vmul.f32 %v3924_v38, %v3840_v23 }
 0x36b   : > { %v2813_v25 = vpop.eup %2812  ;;  %v1583_v14 = vadd.f32 -60.0, %v1467_v42  ;;  %v1469_v37 = vmul.f32 %v2811_v43, %v4129_v39  ;;  %v4176_v41 = vmul.f32 0.007874016, %v1238_v63  ;;  %vm1493_vm10 = vcmp.eq.f32.partialorder %v4164_v49, 0.0 }
 0x36c   : > { %1782 = vst [vmem:[%s3955_s13 + $0x98] sm:$0xff] %v1744_v46  ;;  %v1700_v62 = vmul.f32 %v2813_v25, %v1662_v52 }
 0x36d   : > { %2826 = vrcp.f32 %v1583_v14  ;;  %v1471_v5 = vsel %vm1470_vm3, %v4129_v39, %v1469_v37  ;;  %vm1498_vm11 = vcmp.eq.f32.partialorder %v4176_v41, inf  ;;  %vm1500_vm12 = vcmp.eq.f32.partialorder %v4176_v41, 0.0 }
 0x36e   : > { %v2815_v16 = vpop.eup %2814  ;;  %v1745_v34 = vadd.f32 %v3939_v27, %v1700_v62  ;;  %v1474_v28 = vsel %vm1472_vm4, %v1473_v40, %v1471_v5  ;;  %2828 = vrsqrt.f32 %v4176_v41  ;;  %v1240_v22 = vpop.xlane.xlu0 %1239  ;;  %v1667_v62 = vmul.f32 %v3924_v38, %v3845_v59 }
 0x36f   : > { %v2817_v12 = vpop.eup %2816  ;;  %v1701_v3 = vmul.f32 %v2815_v16, %v1663_v15  ;;  %v1584_v58 = vadd.f32 -60.0, %v1474_v28  ;;  %v4187_v50 = vmul.f32 0.007874016, %v1240_v22 }
 0x370   : > { %1783 = vst [vmem:[%s3955_s13 + $0xa0] sm:$0xff] %v1745_v34  ;;  %v1476_v13 = vmul.f32 %v2817_v12, %v4140_v60 }
 0x371   : > { %v1746_v39 = vadd.f32 %v3939_v27, %v1701_v3  ;;  %2830 = vrcp.f32 %v1584_v58  ;;  %vm1505_vm13 = vcmp.eq.f32.partialorder %v4187_v50, inf  ;;  %vm1507_vm14 = vcmp.eq.f32.partialorder %v4187_v50, 0.0 }
 0x372   : > { %v2819_v33 = vpop.eup %2818  ;;  %v1478_v31 = vsel %vm1477_vm5, %v4140_v60, %v1476_v13  ;;  %2832 = vrsqrt.f32 %v4187_v50  ;;  %v1242_v48 = vpop.xlane.xlu1 %1241  ;;  %v1487_v60 = vand.u32 2147483648, %v4152_v36 }
 0x373   : > { %v2821_v24 = vpop.eup %2820  ;;  %1784 = vst [vmem:[%s3955_s13 + $0xa8] sm:$0xff] %v1746_v39  ;;  %v1702_v19 = vmul.f32 %v2819_v33, %v1664_v9  ;;  %v1481_v54 = vsel %vm1479_vm6, %v1480_v30, %v1478_v31  ;;  %v4200_v10 = vmul.f32 0.007874016, %v1242_v48  ;;  %v1508_v39 = vand.u32 2147483648, %v4187_v50 }
 0x374   : > { %v1585_v57 = vadd.f32 -60.0, %v1481_v54  ;;  %v1483_v6 = vmul.f32 %v2821_v24, %v4152_v36  ;;  %v1668_v30 = vmul.f32 %v3924_v38, %v3850_v32 }
 0x375   : > { %v1747_v47 = vadd.f32 %v3939_v27, %v1702_v19  ;;  %2834 = vrsqrt.f32 %v4200_v10  ;;  %vm1512_vm15 = vcmp.eq.f32.partialorder %v4200_v10, inf  ;;  %v1515_v32 = vand.u32 2147483648, %v4200_v10 }
 0x376   : > { %v2823_v2 = vpop.eup %2822  ;;  %2836 = vrcp.f32 %v1585_v57  ;;  %v1485_v20 = vsel %vm1484_vm7, %v4152_v36, %v1483_v6  ;;  %v1244_v51 = vpop.xlane.xlu0 %1243  ;;  %v1494_v36 = vand.u32 2147483648, %v4164_v49  ;;  %vm1514_vm0 = vcmp.eq.f32.partialorder %v4200_v10, 0.0 }
 0x377   : > { %v2825_v4 = vpop.eup %2824  ;;  %1785 = vst [vmem:[%s3955_s13 + $0xb0] sm:$0xff] %v1747_v47  ;;  %v1703_v17 = vmul.f32 %v2823_v2, %v1665_v55  ;;  %v1488_v45 = vsel %vm1486_vm8, %v1487_v60, %v1485_v20  ;;  %v4212_v21 = vmul.f32 0.007874016, %v1244_v51  ;;  %v1669_v47 = vmul.f32 %v3924_v38, %v3855_v26 }
 0x378   : > { %v1586_v8 = vadd.f32 -60.0, %v1488_v45  ;;  %v1490_v43 = vmul.f32 %v2825_v4, %v4164_v49 }
 0x379   : > { %v1748_v52 = vadd.f32 %v3939_v27, %v1703_v17  ;;  %2838 = vrsqrt.f32 %v4212_v21  ;;  %vm1519_vm1 = vcmp.eq.f32.partialorder %v4212_v21, inf  ;;  %vm1521_vm2 = vcmp.eq.f32.partialorder %v4212_v21, 0.0 }
 0x37a   : > { %v2827_v46 = vpop.eup %2826  ;;  %2840 = vrcp.f32 %v1586_v8  ;;  %v1492_v42 = vsel %vm1491_vm9, %v4164_v49, %v1490_v43  ;;  %v1246_v63 = vpop.xlane.xlu1 %1245  ;;  %v1501_v49 = vand.u32 2147483648, %v4176_v41  ;;  %v1670_v43 = vmul.f32 %v3924_v38, %v3860_v35 }
 0x37b   : > { %v2829_v25 = vpop.eup %2828  ;;  %1786 = vst [vmem:[%s3955_s13 + $0xb8] sm:$0xff] %v1748_v52  ;;  %v1704_v23 = vmul.f32 %v2827_v46, %v1666_v18  ;;  %v1495_v14 = vsel %vm1493_vm10, %v1494_v36, %v1492_v42  ;;  %v4224_v37 = vmul.f32 0.007874016, %v1246_v63  ;;  %v1522_v18 = vand.u32 2147483648, %v4212_v21 }
 0x37c   : > { %v1587_v40 = vadd.f32 -60.0, %v1495_v14  ;;  %v1497_v15 = vmul.f32 %v2829_v25, %v4176_v41 }
 0x37d   : > { %v1749_v5 = vadd.f32 %v3939_v27, %v1704_v23  ;;  %2842 = vrsqrt.f32 %v4224_v37  ;;  %vm1526_vm3 = vcmp.eq.f32.partialorder %v4224_v37, inf  ;;  %vm1528_vm4 = vcmp.eq.f32.partialorder %v4224_v37, 0.0 }
 0x37e   : > { %v2831_v16 = vpop.eup %2830  ;;  %2844 = vrcp.f32 %v1587_v40  ;;  %v1499_v34 = vsel %vm1498_vm11, %v4176_v41, %v1497_v15  ;;  %v1248_v28 = vpop.xlane.xlu0 %1247  ;;  %v1671_v40 = vmul.f32 %v3924_v38, %v3865_v29 }
 0x37f   : > { %v2833_v22 = vpop.eup %2832  ;;  %1787 = vst [vmem:[%s3955_s13 + $0xc0] sm:$0xff] %v1749_v5  ;;  %v1705_v59 = vmul.f32 %v2831_v16, %v1667_v62  ;;  %v1502_v12 = vsel %vm1500_vm12, %v1501_v49, %v1499_v34  ;;  %v4236_v3 = vmul.f32 0.007874016, %v1248_v28 }
 0x380   : > { %v1588_v58 = vadd.f32 -60.0, %v1502_v12  ;;  %v1504_v9 = vmul.f32 %v2833_v22, %v4187_v50 }
 0x381   : > { %v1750_v13 = vadd.f32 %v3939_v27, %v1705_v59  ;;  %2846 = vrsqrt.f32 %v4236_v3  ;;  %vm1533_vm5 = vcmp.eq.f32.partialorder %v4236_v3, inf  ;;  %vm1535_vm6 = vcmp.eq.f32.partialorder %v4236_v3, 0.0 }
 0x382   : > { %v2835_v41 = vpop.eup %2834  ;;  %2848 = vrcp.f32 %v1588_v58  ;;  %v1506_v33 = vsel %vm1505_vm13, %v4187_v50, %v1504_v9  ;;  %v1250_v31 = vpop.xlane.xlu1 %1249  ;;  %v1672_v59 = vmul.f32 %v3924_v38, %v3870_v1 }
 0x383   : > { %v2837_v48 = vpop.eup %2836  ;;  %1788 = vst [vmem:[%s3955_s13 + $0xc8] sm:$0xff] %v1750_v13  ;;  %v1509_v24 = vsel %vm1507_vm14, %v1508_v39, %v1506_v33  ;;  %v1511_v19 = vmul.f32 %v2835_v41, %v4200_v10  ;;  %v4249_v54 = vmul.f32 0.007874016, %v1250_v31 }
 0x384   : > { %v1706_v55 = vmul.f32 %v2837_v48, %v1668_v30  ;;  %v1589_v57 = vadd.f32 -60.0, %v1509_v24 }
 0x385   : > { %v1513_v6 = vsel %vm1512_vm15, %v4200_v10, %v1511_v19  ;;  %2850 = vrsqrt.f32 %v4249_v54  ;;  %vm1540_vm7 = vcmp.eq.f32.partialorder %v4249_v54, inf  ;;  %v1543_v30 = vand.u32 2147483648, %v4249_v54 }
 0x386   : > { %v2839_v50 = vpop.eup %2838  ;;  %v1751_v60 = vadd.f32 %v3939_v27, %v1706_v55  ;;  %2852 = vrcp.f32 %v1589_v57  ;;  %v1516_v2 = vsel %vm1514_vm0, %v1515_v32, %v1513_v6  ;;  %v1252_v20 = vpop.xlane.xlu0 %1251  ;;  %vm1542_vm8 = vcmp.eq.f32.partialorder %v4249_v54, 0.0 }
 0x387   : > { %v2841_v51 = vpop.eup %2840  ;;  %v1590_v4 = vadd.f32 -60.0, %v1516_v2  ;;  %v1518_v17 = vmul.f32 %v2839_v50, %v4212_v21  ;;  %v4260_v45 = vmul.f32 0.007874016, %v1252_v20 }
 0x388   : > { %1789 = vst [vmem:[%s3955_s13 + $0xd0] sm:$0xff] %v1751_v60  ;;  %v1707_v10 = vmul.f32 %v2841_v51, %v1669_v47 }
 0x389   : > { %2854 = vrcp.f32 %v1590_v4  ;;  %v1520_v26 = vsel %vm1519_vm1, %v4212_v21, %v1518_v17  ;;  %v1529_v21 = vand.u32 2147483648, %v4224_v37  ;;  %vm1547_vm9 = vcmp.eq.f32.partialorder %v4260_v45, inf }
 0x38a   : > { %v2843_v8 = vpop.eup %2842  ;;  %v1752_v52 = vadd.f32 %v3939_v27, %v1707_v10  ;;  %v1523_v36 = vsel %vm1521_vm2, %v1522_v18, %v1520_v26  ;;  %2856 = vrsqrt.f32 %v4260_v45  ;;  %v1254_v25 = vpop.xlane.xlu1 %1253  ;;  %vm1549_vm10 = vcmp.eq.f32.partialorder %v4260_v45, 0.0 }
 0x38b   : > { %v2845_v46 = vpop.eup %2844  ;;  %v1591_v42 = vadd.f32 -60.0, %v1523_v36  ;;  %v1525_v63 = vmul.f32 %v2843_v8, %v4224_v37  ;;  %v4275_v14 = vmul.f32 0.007874016, %v1254_v25 }
 0x38c   : > { %1790 = vst [vmem:[%s3955_s13 + $0xd8] sm:$0xff] %v1752_v52  ;;  %v1708_v23 = vmul.f32 %v2845_v46, %v1670_v43 }
 0x38d   : > { %2858 = vrcp.f32 %v1591_v42  ;;  %v1527_v35 = vsel %vm1526_vm3, %v4224_v37, %v1525_v63  ;;  %v1536_v37 = vand.u32 2147483648, %v4236_v3  ;;  %vm1554_vm11 = vcmp.eq.f32.partialorder %v4275_v14, inf }
 0x38e   : > { %v2847_v62 = vpop.eup %2846  ;;  %v1753_v15 = vadd.f32 %v3939_v27, %v1708_v23  ;;  %v1530_v5 = vsel %vm1528_vm4, %v1529_v21, %v1527_v35  ;;  %2860 = vrsqrt.f32 %v4275_v14  ;;  %v1557_v17 = vand.u32 2147483648, %v4275_v14 }
 0x38f   : > { %v2849_v49 = vpop.eup %2848  ;;  %v1592_v16 = vadd.f32 -60.0, %v1530_v5  ;;  %v1532_v34 = vmul.f32 %v2847_v62, %v4236_v3  ;;  %vm1556_vm12 = vcmp.eq.f32.partialorder %v4275_v14, 0.0 }
 0x390   : > { %1791 = vst [vmem:[%s3955_s13 + $0xe0] sm:$0xff] %v1753_v15  ;;  %v1709_v28 = vmul.f32 %v2849_v49, %v1671_v40 }
 0x391   : > { %2862 = vrcp.f32 %v1592_v16  ;;  %v1534_v22 = vsel %vm1533_vm5, %v4236_v3, %v1532_v34  ;;  %v2872_v3 = vld [vmem:[%s4482_s3] ss:$0 sm:$0xff] }
 0x392   : > { %v2851_v29 = vpop.eup %2850  ;;  %v1754_v12 = vadd.f32 %v3939_v27, %v1709_v28  ;;  %v1537_v58 = vsel %vm1535_vm6, %v1536_v37, %v1534_v22  ;;  %v1673_v1 = vmul.f32 %v2872_v3, %v3875_v11  ;;  %v1674_v57 = vmul.f32 %v2872_v3, %v3880_v53  ;;  %v2873_v11 = vld [vmem:[%s4483_s4] ss:$0 sm:$0xff] }
 0x393   : > { %v2853_v9 = vpop.eup %2852  ;;  %v1593_v13 = vadd.f32 -60.0, %v1537_v58  ;;  %v1539_v39 = vmul.f32 %v2851_v29, %v4249_v54  ;;  %v1675_v51 = vmul.f32 %v2872_v3, %v3885_v44  ;;  %v1676_v44 = vmul.f32 %v2872_v3, %v3890_v56 }
 0x394   : > { %1792 = vst [vmem:[%s3955_s13 + $0xe8] sm:$0xff] %v1754_v12  ;;  %v1710_v41 = vmul.f32 %v2853_v9, %v1672_v59  ;;  %v1677_v46 = vmul.f32 %v2872_v3, %v3895_v61  ;;  %v1678_v21 = vmul.f32 %v2872_v3, %v3900_v0  ;;  %v1679_v56 = vmul.f32 %v2872_v3, %v3905_v7 }
 0x395   : > { %2864 = vrcp.f32 %v1593_v13  ;;  %v1541_v38 = vsel %vm1540_vm7, %v4249_v54, %v1539_v39 }
 0x396   : > { %v2855_v33 = vpop.eup %2854  ;;  %v1755_v31 = vadd.f32 %v3939_v27, %v1710_v41  ;;  %v1544_v48 = vsel %vm1542_vm8, %v1543_v30, %v1541_v38  ;;  %v1550_v27 = vand.u32 2147483648, %v4260_v45 }
 0x397   : > { %v2857_v24 = vpop.eup %2856  ;;  %v1711_v19 = vmul.f32 %v2855_v33, %v1673_v1  ;;  %v1594_v55 = vadd.f32 -60.0, %v1544_v48 }
 0x398   : > { %1793 = vst [vmem:[%s3955_s13 + $0xf0] sm:$0xff] %v1755_v31  ;;  %v1546_v32 = vmul.f32 %v2857_v24, %v4260_v45 }
 0x399   : > { %v1756_v6 = vadd.f32 %v2873_v11, %v1711_v19  ;;  %2866 = vrcp.f32 %v1594_v55 }
 0x39a   : > { %v2859_v54 = vpop.eup %2858  ;;  %v1548_v50 = vsel %vm1547_vm9, %v4260_v45, %v1546_v32 }
 0x39b   : > { %v2861_v53 = vpop.eup %2860  ;;  %1794 = vst [vmem:[%s3955_s13 + $0xf8] sm:$0xff] %v1756_v6  ;;  %v1712_v47 = vmul.f32 %v2859_v54, %v1674_v57  ;;  %v1551_v60 = vsel %vm1549_vm10, %v1550_v27, %v1548_v50 }
 0x39c   : > { %v1595_v2 = vadd.f32 -60.0, %v1551_v60  ;;  %v1553_v20 = vmul.f32 %v2861_v53, %v4275_v14 }
 0x39d   : > { %v1757_v4 = vadd.f32 %v2873_v11, %v1712_v47 }
 0x39e   : > { %v2863_v10 = vpop.eup %2862  ;;  %2868 = vrcp.f32 %v1595_v2  ;;  %v1555_v45 = vsel %vm1554_vm11, %v4275_v14, %v1553_v20 }
 0x39f   : > { %1795 = vst [vmem:[%s3955_s13 + $0x100] sm:$0xff] %v1757_v4  ;;  %v1713_v18 = vmul.f32 %v2863_v10, %v1675_v51  ;;  %v1558_v26 = vsel %vm1556_vm12, %v1557_v17, %v1555_v45 }
 0x3a0   : > { %v1596_v8 = vadd.f32 -60.0, %v1558_v26 }
 0x3a1   : > { %v1758_v43 = vadd.f32 %v2873_v11, %v1713_v18 }
 0x3a2   : > { %v2865_v52 = vpop.eup %2864  ;;  %2870 = vrcp.f32 %v1596_v8 }
 0x3a3   : > { %1796 = vst [vmem:[%s3955_s13 + $0x108] sm:$0xff] %v1758_v43  ;;  %v1714_v36 = vmul.f32 %v2865_v52, %v1676_v44 }
 0x3a5   : > { %v1759_v42 = vadd.f32 %v2873_v11, %v1714_v36 }
 0x3a6   : > { %v2867_v63 = vpop.eup %2866 }
 0x3a7   : > { %1797 = vst [vmem:[%s3955_s13 + $0x110] sm:$0xff] %v1759_v42  ;;  %v1715_v25 = vmul.f32 %v2867_v63, %v1677_v46 }
 0x3a9   : > { %v1760_v23 = vadd.f32 %v2873_v11, %v1715_v25 }
 0x3ab   : > { %v2869_v14 = vpop.eup %2868  ;;  %1798 = vst [vmem:[%s3955_s13 + $0x118] sm:$0xff] %v1760_v23 }
 0x3ac   : > { %v1716_v35 = vmul.f32 %v2869_v14, %v1678_v21 }
 0x3ae   : > { %v1761_v62 = vadd.f32 %v2873_v11, %v1716_v35 }
 0x3af   : > { %v2871_v40 = vpop.eup %2870 }
 0x3b0   : > { %1799 = vst [vmem:[%s3955_s13 + $0x120] sm:$0xff] %v1761_v62  ;;  %v1717_v15 = vmul.f32 %v2871_v40, %v1679_v56  ;;  %1807 = sbr.rel (!%p3023_p4) target bundleno = 1014 (0x3f6), region = 44 }
 0x3b2   : > { %v1762_v5 = vadd.f32 %v2873_v11, %v1717_v15 }
 0x3b4   : > { %1800 = vst [vmem:[%s3955_s13 + $0x128] sm:$0xff] %v1762_v5 }
 0x3b5   : > { %s4495_s20 = smov (!%p1810_p8, %s1809_s20), 38 }
 0x3b6   : > { %s2209_s30 = sshll.u32 %s4495_s20, 7 }
 0x3b7   : > { %p2212_p9 = scmp.eq.s32.totalorder %s2209_s30, 0 }
 0x3b8   : > { %2874 = sdivrem.u32 (!%p2212_p9), %s4495_s20, 38 }
 0x3b9   : > { %1818 = sbr.rel (%p2212_p9) target bundleno = 1014 (0x3f6), region = 48 }
 0x3c1   : > { %s4343_s26 = spop.drf %2874 }
 0x3c2   : > { %p2213_p10 = scmp.le.s32.totalorder %s4343_s26, 0 }
 0x3c3   : > { %s4486_s21 = smov (!%p2213_p10), %s4337_s29  ;;  %s4487_s8 = smov (!%p2213_p10), %s3955_s13 }
 0x3c4   : > { %2123 = sbr.rel (%p2213_p10) target bundleno = 989 (0x3dd), region = 126  ;;  %s4352_s27 = smov (!%p2213_p10), 0  }
 0x3c5   : > { %s4354_s6 = smov (!%p2213_p10), 0  }
 0x3c9 LB: >> { %v1957_v61 = vld [vmem:[%s2940_s8] sm:$0xff]  ;;  %v1959_v0 = vld [vmem:[%s2940_s8 + $0x8] sm:$0xff]  ;;  %v1961_v7 = vld [vmem:[%s2940_s8 + $0x10] sm:$0xff]  ;;  %s2033_s7 = sadd.s32 1, %s2944_s27  ;;  %s1951_s6 = sadd.s32 1, %s2948_s6   ;;  %s2948_s6 = sphi %s4354_s6, %s1951_s6   ;;  %s2944_s27 = sphi %s4352_s27, %s4490_s27   ;;  %s2940_s8 = sphi %s4487_s8, %s4489_s8   ;;  %s2936_s21 = sphi %s4486_s21, %s4488_s21  }
 0x3ca   : >> { %1958 = vst [vmem:[%s2936_s21] sm:$0xff] %v1957_v61  ;;  %1960 = vst [vmem:[%s2936_s21 + $0x8] sm:$0xff] %v1959_v0  ;;  %v1963_v49 = vld [vmem:[%s2940_s8 + $0x18] sm:$0xff]  ;;  %v1965_v16 = vld [vmem:[%s2940_s8 + $0x20] sm:$0xff]  ;;  %p2034_p11 = scmp.ge.s32.totalorder %s2033_s7, %s4343_s26  ;;  %p1950_p12 = scmp.ge.s32.totalorder %s1951_s6, %s4343_s26 }
 0x3cb   : >> { %1962 = vst [vmem:[%s2936_s21 + $0x10] sm:$0xff] %v1961_v7  ;;  %v1967_v34 = vld [vmem:[%s2940_s8 + $0x28] sm:$0xff]  ;;  %1964 = vst [vmem:[%s2936_s21 + $0x18] sm:$0xff] %v1963_v49  ;;  %v1969_v28 = vld [vmem:[%s2940_s8 + $0x30] sm:$0xff] }
 0x3cc   : >> { %1966 = vst [vmem:[%s2936_s21 + $0x20] sm:$0xff] %v1965_v16  ;;  %1968 = vst [vmem:[%s2936_s21 + $0x28] sm:$0xff] %v1967_v34  ;;  %v1971_v37 = vld [vmem:[%s2940_s8 + $0x38] sm:$0xff]  ;;  %v1973_v22 = vld [vmem:[%s2940_s8 + $0x40] sm:$0xff]  ;;  %s4497_s7 = smov (%p2034_p11, %s2033_s7), 0 }
 0x3cd   : >> { %1970 = vst [vmem:[%s2936_s21 + $0x30] sm:$0xff] %v1969_v28  ;;  %1972 = vst [vmem:[%s2936_s21 + $0x38] sm:$0xff] %v1971_v37  ;;  %v1975_v29 = vld [vmem:[%s2940_s8 + $0x48] sm:$0xff]  ;;  %v1977_v59 = vld [vmem:[%s2940_s8 + $0x50] sm:$0xff]  ;;  %s2036_s9 = smul.u32 304, %s4497_s7  ;;  %s4490_s27 = smov %s4497_s7 }
 0x3ce   : >> { %1974 = vst [vmem:[%s2936_s21 + $0x40] sm:$0xff] %v1973_v22  ;;  %v1979_v12 = vld [vmem:[%s2940_s8 + $0x58] sm:$0xff]  ;;  %1976 = vst [vmem:[%s2936_s21 + $0x48] sm:$0xff] %v1975_v29  ;;  %v1981_v58 = vld [vmem:[%s2940_s8 + $0x60] sm:$0xff] }
 0x3cf   : >> { %1978 = vst [vmem:[%s2936_s21 + $0x50] sm:$0xff] %v1977_v59  ;;  %1980 = vst [vmem:[%s2936_s21 + $0x58] sm:$0xff] %v1979_v12  ;;  %v1983_v9 = vld [vmem:[%s2940_s8 + $0x68] sm:$0xff]  ;;  %v1985_v13 = vld [vmem:[%s2940_s8 + $0x70] sm:$0xff]  ;;  %s4416_s10 = scalar_lea.vmem %s3955_s13, %s2036_s9 [#allocation2]   ;;  %s4419_s11 = scalar_lea.vmem %s4337_s29, %s2036_s9  }
 0x3d0   : >> { %1982 = vst [vmem:[%s2936_s21 + $0x60] sm:$0xff] %v1981_v58  ;;  %1984 = vst [vmem:[%s2936_s21 + $0x68] sm:$0xff] %v1983_v9  ;;  %v1987_v39 = vld [vmem:[%s2940_s8 + $0x78] sm:$0xff]  ;;  %v1989_v41 = vld [vmem:[%s2940_s8 + $0x80] sm:$0xff] }
 0x3d1   : >> { %1986 = vst [vmem:[%s2936_s21 + $0x70] sm:$0xff] %v1985_v13  ;;  %v1991_v30 = vld [vmem:[%s2940_s8 + $0x88] sm:$0xff]  ;;  %1988 = vst [vmem:[%s2936_s21 + $0x78] sm:$0xff] %v1987_v39  ;;  %v1993_v3 = vld [vmem:[%s2940_s8 + $0x90] sm:$0xff] }
 0x3d2   : >> { %1990 = vst [vmem:[%s2936_s21 + $0x80] sm:$0xff] %v1989_v41  ;;  %1992 = vst [vmem:[%s2936_s21 + $0x88] sm:$0xff] %v1991_v30  ;;  %v1995_v1 = vld [vmem:[%s2940_s8 + $0x98] sm:$0xff]  ;;  %v1997_v38 = vld [vmem:[%s2940_s8 + $0xa0] sm:$0xff] }
 0x3d3   : >> { %1994 = vst [vmem:[%s2936_s21 + $0x90] sm:$0xff] %v1993_v3  ;;  %1996 = vst [vmem:[%s2936_s21 + $0x98] sm:$0xff] %v1995_v1  ;;  %v1999_v33 = vld [vmem:[%s2940_s8 + $0xa8] sm:$0xff]  ;;  %v2001_v31 = vld [vmem:[%s2940_s8 + $0xb0] sm:$0xff] }
 0x3d4   : >> { %1998 = vst [vmem:[%s2936_s21 + $0xa0] sm:$0xff] %v1997_v38  ;;  %v2003_v48 = vld [vmem:[%s2940_s8 + $0xb8] sm:$0xff]  ;;  %2000 = vst [vmem:[%s2936_s21 + $0xa8] sm:$0xff] %v1999_v33  ;;  %v2005_v24 = vld [vmem:[%s2940_s8 + $0xc0] sm:$0xff] }
 0x3d5   : >> { %2002 = vst [vmem:[%s2936_s21 + $0xb0] sm:$0xff] %v2001_v31  ;;  %2004 = vst [vmem:[%s2936_s21 + $0xb8] sm:$0xff] %v2003_v48  ;;  %v2007_v19 = vld [vmem:[%s2940_s8 + $0xc8] sm:$0xff]  ;;  %v2009_v55 = vld [vmem:[%s2940_s8 + $0xd0] sm:$0xff] }
 0x3d6   : >> { %2006 = vst [vmem:[%s2936_s21 + $0xc0] sm:$0xff] %v2005_v24  ;;  %2008 = vst [vmem:[%s2936_s21 + $0xc8] sm:$0xff] %v2007_v19  ;;  %v2011_v57 = vld [vmem:[%s2940_s8 + $0xd8] sm:$0xff]  ;;  %v2013_v32 = vld [vmem:[%s2940_s8 + $0xe0] sm:$0xff] }
 0x3d7   : >> { %2010 = vst [vmem:[%s2936_s21 + $0xd0] sm:$0xff] %v2009_v55  ;;  %v2015_v11 = vld [vmem:[%s2940_s8 + $0xe8] sm:$0xff]  ;;  %2012 = vst [vmem:[%s2936_s21 + $0xd8] sm:$0xff] %v2011_v57  ;;  %v2017_v6 = vld [vmem:[%s2940_s8 + $0xf0] sm:$0xff] }
 0x3d8   : >> { %2014 = vst [vmem:[%s2936_s21 + $0xe0] sm:$0xff] %v2013_v32  ;;  %2016 = vst [vmem:[%s2936_s21 + $0xe8] sm:$0xff] %v2015_v11  ;;  %v2019_v27 = vld [vmem:[%s2940_s8 + $0xf8] sm:$0xff]  ;;  %v2021_v54 = vld [vmem:[%s2940_s8 + $0x100] sm:$0xff]  ;;  %1953 = sbr.rel (!%p1950_p12) target bundleno = 969 (0x3c9), region = 132 }
 0x3d9   : >> { %2018 = vst [vmem:[%s2936_s21 + $0xf0] sm:$0xff] %v2017_v6  ;;  %2020 = vst [vmem:[%s2936_s21 + $0xf8] sm:$0xff] %v2019_v27  ;;  %v2023_v50 = vld [vmem:[%s2940_s8 + $0x108] sm:$0xff]  ;;  %v2025_v53 = vld [vmem:[%s2940_s8 + $0x110] sm:$0xff] }
 0x3da   : >> { %2022 = vst [vmem:[%s2936_s21 + $0x100] sm:$0xff] %v2021_v54  ;;  %v2027_v47 = vld [vmem:[%s2940_s8 + $0x118] sm:$0xff]  ;;  %2024 = vst [vmem:[%s2936_s21 + $0x108] sm:$0xff] %v2023_v50  ;;  %v2029_v60 = vld [vmem:[%s2940_s8 + $0x120] sm:$0xff] }
 0x3db   : >> { %2026 = vst [vmem:[%s2936_s21 + $0x110] sm:$0xff] %v2025_v53  ;;  %2028 = vst [vmem:[%s2936_s21 + $0x118] sm:$0xff] %v2027_v47  ;;  %v2031_v2 = vld [vmem:[%s2940_s8 + $0x128] sm:$0xff]  ;;  %s4489_s8 = smov %s4416_s10 }
 0x3dc   : >> { %2030 = vst [vmem:[%s2936_s21 + $0x120] sm:$0xff] %v2029_v60  ;;  %2032 = vst [vmem:[%s2936_s21 + $0x128] sm:$0xff] %v2031_v2  ;;  %s4488_s21 = smov %s4419_s11 }
 0x3dd PF: > { %2876 = sdivrem.u32 %s4495_s20, 38 }
 0x3de   : > { %s2214_s18 = smul.u32 304, %s4343_s26 }
 0x3e0   : > { %s2044_s12 = scalar_lea.vmem %s3955_s13, %s2214_s18 [#allocation2]   ;;  %s2046_s14 = scalar_lea.vmem %s4337_s29, %s2214_s18  }
 0x3e6   : > { %s2877_s15 = spop.drf %2876 }
 0x3e7   : > { %p2216_p13 = scmp.le.s32.totalorder %s2877_s15, 0 }
 0x3e8   : > { %s2950_s16 = smov (!%p2216_p13), %s2046_s14   ;;  %s2954_s17 = smov (!%p2216_p13), %s2044_s12  }
 0x3e9   : > { %2137 = sbr.rel (%p2216_p13) target bundleno = 1014 (0x3f6), region = 137  ;;  %s2958_s23 = smov (!%p2216_p13), 0  }
 0x3ea   : > { %s2962_s24 = smov (!%p2216_p13), 0  }
 0x3ee LB: >> { %v2056_v20 = vld [vmem:[%s2956_s17] sm:$0xff]  ;;  %s2058_s28 = sadd.s32 1, %s2960_s23  ;;  %s2050_s24 = sadd.s32 1, %s2964_s24   ;;  %s2964_s24 = sphi %s2962_s24, %s2050_s24   ;;  %s2960_s23 = sphi %s2958_s23, %s2959_s23   ;;  %s2956_s17 = sphi %s2954_s17, %s2063_s17   ;;  %s2952_s16 = sphi %s2950_s16, %s2064_s16  }
 0x3ef   : >> { %2057 = vst [vmem:[%s2952_s16] sm:$0xff] %v2056_v20  ;;  %p2059_p0 = scmp.ge.s32.totalorder %s2058_s28, %s2877_s15  ;;  %p2049_p1 = scmp.ge.s32.totalorder %s2050_s24, %s2877_s15 }
 0x3f1   : >> { %s4499_s28 = smov (%p2059_p0, %s2058_s28), 0  ;;  %2052 = sbr.rel (!%p2049_p1) target bundleno = 1006 (0x3ee), region = 143 }
 0x3f2   : >> { %s2217_s13 = sshll.u32 %s4499_s28, 3  ;;  %s2959_s23 = smov %s4499_s28  }
 0x3f3   : >> { %s2063_s17 = scalar_lea.vmem %s2044_s12, %s2217_s13 [#allocation2]   ;;  %s2064_s16 = scalar_lea.vmem %s2046_s14, %s2217_s13  }
 0x3f6 PF: > { %p12_p2 = scmp.ge.s32.totalorder %s3013_s22, 4   ;;  %s4491_s18 = smov %s2928_s19 }
 0x3f7   : > { %s4492_s19 = smov %s3021_s25  ;;  %s4493_s20 = smov %s3013_s22 }
 0x3f8   :  { %14 = sbr.rel (!%p12_p2) target bundleno = 2 (0x2), region = 154 }

</bundles_post_ra>
